<compile_context>
chip_gen: v7x
topology: tpu7x:2x2x1
jax: 0.10.0
libtpu: 0.0.40
codegen_flags: <defaults>
</compile_context>

<pallas_src>
import jax
import jax.numpy as jnp
import numpy as np
from jax.experimental import pallas as pl
from jax.experimental.pallas import tpu as pltpu


def firstnet_kernel(x_ref,                      # (T*B, D_in)  time-major, timestep-blocked
                    wf_ref,                     # (D_in, 3S)   fused input weight, gate cols r|z|n
                    bf_ref,                     # (1, 3S)      fused input bias (b_hr, b_hz folded in)
                    whr_ref, whz_ref, whn_ref,  # (S, S)       hidden weights per gate
                    bhn_ref,                    # (1, S)       hidden bias of the n gate
                    out_ref):                   # (B, S)       final hidden state
    """Whole FirstNet forward in one invocation.

    x_ref row t*B + b == x[b, t, :].
    """
    TB, _ = x_ref.shape
    B, S = out_ref.shape
    T = TB // B

    # Fused (Linear -> GRU input projection) for ALL timesteps and gates: one matmul,
    # entirely off the serial recurrence. Gate split happens once, outside the loop.
    gi = jnp.dot(x_ref[...], wf_ref[...], preferred_element_type=jnp.float32) + bf_ref[...]
    gi_r = gi[:, :S]
    gi_z = gi[:, S:2 * S]
    gi_n = gi[:, 2 * S:]

    # Hoist weight/bias loads out of the loop.
    whr = whr_ref[...]
    whz = whz_ref[...]
    whn = whn_ref[...]
    bhn = bhn_ref[...]

    h = jnp.zeros((B, S), dtype=jnp.float32)
    for t in range(T):                          # static unroll (small fixed T)
        lo = t * B                              # static sublane-only slice offsets
        r = jax.nn.sigmoid(gi_r[lo:lo + B, :]
                           + jnp.dot(h, whr, preferred_element_type=jnp.float32))
        z = jax.nn.sigmoid(gi_z[lo:lo + B, :]
                           + jnp.dot(h, whz, preferred_element_type=jnp.float32))
        n = jnp.tanh(gi_n[lo:lo + B, :]
                     + r * (jnp.dot(h, whn, preferred_element_type=jnp.float32) + bhn))
        h = n + z * (h - n)                     # == (1 - z) * n + z * h

    out_ref[...] = h.astype(out_ref.dtype)


def firstnet_forward(x, params):
    """x: (B, T, input_dim) float32 (batch_first, like PyTorch).
    Returns hn.transpose(0, 1): (B, 1, state_dim)."""
    B, T, D_in = x.shape
    wl, bl, wih, whh, bih, bhh = params
    S = whh.shape[0]

    hi = jax.lax.Precision.HIGHEST
    # Fuse the Linear into the GRU input projection (dropout == identity in eval mode):
    #   gi = (x @ Wl + bl) @ Wih + bih = x @ (Wl @ Wih) + (bl @ Wih + bih)
    wf = jnp.dot(wl, wih, precision=hi)                     # (D_in, 3S)
    bf = jnp.dot(bl, wih, precision=hi) + bih               # (1, 3S)
    # Fold the r/z hidden biases into the input-side bias (pre-activation adds):
    bf = bf.at[:, :2 * S].add(bhh[:, :2 * S])
    bhn = bhh[:, 2 * S:]                                    # (1, S) stays in the n gate

    # Hidden weights pre-split per gate (r | z | n) to keep lane slicing off the recurrence.
    wh_r, wh_z, wh_n = whh[:, :S], whh[:, S:2 * S], whh[:, 2 * S:]

    # Time-major, timestep-blocked rows: row t*B + b == x[b, t, :]
    x_flat = jnp.transpose(x, (1, 0, 2)).reshape(T * B, D_in)

    vmem = pl.BlockSpec(memory_space=pltpu.MemorySpace.VMEM)
    hn = pl.pallas_call(
        firstnet_kernel,
        out_shape=jax.ShapeDtypeStruct((B, S), jnp.float32),
        in_specs=[vmem] * 7,
        out_specs=vmem,
    )(x_flat, wf, bf, wh_r, wh_z, wh_n, bhn)

    # PyTorch: hn has shape (num_layers=1, B, S); hn.transpose(0, 1) -> (B, 1, S)
    return hn[:, None, :]


def firstnet_reference(x, params):
    """Pure-JAX reference of the same forward pass (unfused, for verification)."""
    wl, bl, wih, whh, bih, bhh = params
    S = whh.shape[0]
    hi = jax.lax.Precision.HIGHEST
    lin = jnp.einsum("btd,dr->btr", x, wl, precision=hi) + bl     # (B, T, R)

    def step(h, x_t):
        gi = jnp.dot(x_t, wih, precision=hi) + bih
        gh = jnp.dot(h, whh, precision=hi) + bhh
        r = jax.nn.sigmoid(gi[:, :S] + gh[:, :S])
        z = jax.nn.sigmoid(gi[:, S:2 * S] + gh[:, S:2 * S])
        n = jnp.tanh(gi[:, 2 * S:] + r * gh[:, 2 * S:])
        h_new = (1.0 - z) * n + z * h
        return h_new, None

    h0 = jnp.zeros((x.shape[0], S), jnp.float32)
    h_fin, _ = jax.lax.scan(step, h0, jnp.transpose(lin, (1, 0, 2)))
    return h_fin[:, None, :]


if __name__ == "__main__":
    # Shapes consistent with the module's example x = torch.randn(30, 5, 10):
    B, T, D_IN = 30, 5, 10
    RNN_DIM, STATE_DIM = 16, 12

    key = jax.random.PRNGKey(0)
    kx, k1, k2, k3, k4, k5, k6 = jax.random.split(key, 7)

    x = jax.random.normal(kx, (B, T, D_IN), dtype=jnp.float32)

    # Deterministic parameter init (uniform, PyTorch-like scale).
    lim_l = 1.0 / np.sqrt(D_IN)
    lim_g = 1.0 / np.sqrt(STATE_DIM)
    params = (
        jax.random.uniform(k1, (D_IN, RNN_DIM), jnp.float32, -lim_l, lim_l),             # linear W^T
        jax.random.uniform(k2, (1, RNN_DIM), jnp.float32, -lim_l, lim_l),                 # linear b
        jax.random.uniform(k3, (RNN_DIM, 3 * STATE_DIM), jnp.float32, -lim_g, lim_g),     # W_ih^T
        jax.random.uniform(k4, (STATE_DIM, 3 * STATE_DIM), jnp.float32, -lim_g, lim_g),   # W_hh^T
        jax.random.uniform(k5, (1, 3 * STATE_DIM), jnp.float32, -lim_g, lim_g),           # b_ih
        jax.random.uniform(k6, (1, 3 * STATE_DIM), jnp.float32, -lim_g, lim_g),           # b_hh
    )

    out = firstnet_forward(x, params)
    jax.block_until_ready(out)

    ref = firstnet_reference(x, params)
    assert out.shape == (B, 1, STATE_DIM), out.shape
    np.testing.assert_allclose(np.asarray(out), np.asarray(ref), rtol=1e-2, atol=1e-2)

    print("KERNEL_OK")
</pallas_src>

<mosaic_0001>
module attributes {stable_mosaic.version = 11 : i64} {
  func.func @firstnet_kernel(%arg0: memref<150x10xf32, #tpu.memory_space<vmem>>, %arg1: memref<10x36xf32, #tpu.memory_space<vmem>>, %arg2: memref<1x36xf32, #tpu.memory_space<vmem>>, %arg3: memref<12x12xf32, #tpu.memory_space<vmem>>, %arg4: memref<12x12xf32, #tpu.memory_space<vmem>>, %arg5: memref<12x12xf32, #tpu.memory_space<vmem>>, %arg6: memref<1x12xf32, #tpu.memory_space<vmem>>, %arg7: memref<30x12xf32, #tpu.memory_space<vmem>>) attributes {dimension_semantics = [], scalar_prefetch = 0 : i64, scratch_operands = 0 : i64, tpu.core_type = #tpu.core_type<tc>} {
    %c0 = arith.constant 0 : index
    %c0_0 = arith.constant 0 : index
    %0 = vector.load %arg0[%c0, %c0_0] : memref<150x10xf32, #tpu.memory_space<vmem>>, vector<150x10xf32>
    %c0_1 = arith.constant 0 : index
    %c0_2 = arith.constant 0 : index
    %1 = vector.load %arg1[%c0_1, %c0_2] : memref<10x36xf32, #tpu.memory_space<vmem>>, vector<10x36xf32>
    %cst = arith.constant dense<0.000000e+00> : vector<150x36xf32>
    %2 = tpu.matmul %0, %1, %cst {dimension_numbers = #tpu.dot_dimension_numbers<[1], [0], [0], [1], [0, 0, 1, 1], [], []>} : vector<150x10xf32>, vector<10x36xf32>, vector<150x36xf32> -> vector<150x36xf32>
    %c0_3 = arith.constant 0 : index
    %c0_4 = arith.constant 0 : index
    %3 = vector.load %arg2[%c0_3, %c0_4] : memref<1x36xf32, #tpu.memory_space<vmem>>, vector<1x36xf32>
    %4 = vector.broadcast %3 : vector<1x36xf32> to vector<150x36xf32>
    %5 = arith.addf %2, %4 : vector<150x36xf32>
    %6 = vector.extract_strided_slice %5 {offsets = [0, 0], sizes = [150, 12], strides = [1, 1]} : vector<150x36xf32> to vector<150x12xf32>
    %7 = vector.extract_strided_slice %5 {offsets = [0, 12], sizes = [150, 12], strides = [1, 1]} : vector<150x36xf32> to vector<150x12xf32>
    %8 = vector.extract_strided_slice %5 {offsets = [0, 24], sizes = [150, 12], strides = [1, 1]} : vector<150x36xf32> to vector<150x12xf32>
    %c0_5 = arith.constant 0 : index
    %c0_6 = arith.constant 0 : index
    %9 = vector.load %arg3[%c0_5, %c0_6] : memref<12x12xf32, #tpu.memory_space<vmem>>, vector<12x12xf32>
    %c0_7 = arith.constant 0 : index
    %c0_8 = arith.constant 0 : index
    %10 = vector.load %arg4[%c0_7, %c0_8] : memref<12x12xf32, #tpu.memory_space<vmem>>, vector<12x12xf32>
    %c0_9 = arith.constant 0 : index
    %c0_10 = arith.constant 0 : index
    %11 = vector.load %arg5[%c0_9, %c0_10] : memref<12x12xf32, #tpu.memory_space<vmem>>, vector<12x12xf32>
    %c0_11 = arith.constant 0 : index
    %c0_12 = arith.constant 0 : index
    %12 = vector.load %arg6[%c0_11, %c0_12] : memref<1x12xf32, #tpu.memory_space<vmem>>, vector<1x12xf32>
    %cst_13 = arith.constant 0.000000e+00 : f32
    %13 = vector.broadcast %cst_13 : f32 to vector<30x12xf32>
    %14 = vector.extract_strided_slice %6 {offsets = [0, 0], sizes = [30, 12], strides = [1, 1]} : vector<150x12xf32> to vector<30x12xf32>
    %cst_14 = arith.constant dense<0.000000e+00> : vector<30x12xf32>
    %15 = tpu.matmul %13, %9, %cst_14 {dimension_numbers = #tpu.dot_dimension_numbers<[1], [0], [0], [1], [0, 0, 1, 1], [], []>} : vector<30x12xf32>, vector<12x12xf32>, vector<30x12xf32> -> vector<30x12xf32>
    %16 = arith.addf %14, %15 : vector<30x12xf32>
    %17 = arith.negf %16 : vector<30x12xf32>
    %18 = math.exp %17 : vector<30x12xf32>
    %cst_15 = arith.constant 1.000000e+00 : f32
    %19 = vector.broadcast %cst_15 : f32 to vector<30x12xf32>
    %20 = arith.addf %19, %18 : vector<30x12xf32>
    %21 = arith.divf %19, %20 : vector<30x12xf32>
    %22 = vector.extract_strided_slice %7 {offsets = [0, 0], sizes = [30, 12], strides = [1, 1]} : vector<150x12xf32> to vector<30x12xf32>
    %cst_16 = arith.constant dense<0.000000e+00> : vector<30x12xf32>
    %23 = tpu.matmul %13, %10, %cst_16 {dimension_numbers = #tpu.dot_dimension_numbers<[1], [0], [0], [1], [0, 0, 1, 1], [], []>} : vector<30x12xf32>, vector<12x12xf32>, vector<30x12xf32> -> vector<30x12xf32>
    %24 = arith.addf %22, %23 : vector<30x12xf32>
    %25 = arith.negf %24 : vector<30x12xf32>
    %26 = math.exp %25 : vector<30x12xf32>
    %cst_17 = arith.constant 1.000000e+00 : f32
    %27 = vector.broadcast %cst_17 : f32 to vector<30x12xf32>
    %28 = arith.addf %27, %26 : vector<30x12xf32>
    %29 = arith.divf %27, %28 : vector<30x12xf32>
    %30 = vector.extract_strided_slice %8 {offsets = [0, 0], sizes = [30, 12], strides = [1, 1]} : vector<150x12xf32> to vector<30x12xf32>
    %cst_18 = arith.constant dense<0.000000e+00> : vector<30x12xf32>
    %31 = tpu.matmul %13, %11, %cst_18 {dimension_numbers = #tpu.dot_dimension_numbers<[1], [0], [0], [1], [0, 0, 1, 1], [], []>} : vector<30x12xf32>, vector<12x12xf32>, vector<30x12xf32> -> vector<30x12xf32>
    %32 = vector.broadcast %12 : vector<1x12xf32> to vector<30x12xf32>
    %33 = arith.addf %31, %32 : vector<30x12xf32>
    %34 = arith.mulf %21, %33 : vector<30x12xf32>
    %35 = arith.addf %30, %34 : vector<30x12xf32>
    %36 = math.tanh %35 : vector<30x12xf32>
    %37 = arith.subf %13, %36 : vector<30x12xf32>
    %38 = arith.mulf %29, %37 : vector<30x12xf32>
    %39 = arith.addf %36, %38 : vector<30x12xf32>
    %40 = vector.extract_strided_slice %6 {offsets = [30, 0], sizes = [30, 12], strides = [1, 1]} : vector<150x12xf32> to vector<30x12xf32>
    %cst_19 = arith.constant dense<0.000000e+00> : vector<30x12xf32>
    %41 = tpu.matmul %39, %9, %cst_19 {dimension_numbers = #tpu.dot_dimension_numbers<[1], [0], [0], [1], [0, 0, 1, 1], [], []>} : vector<30x12xf32>, vector<12x12xf32>, vector<30x12xf32> -> vector<30x12xf32>
    %42 = arith.addf %40, %41 : vector<30x12xf32>
    %43 = arith.negf %42 : vector<30x12xf32>
    %44 = math.exp %43 : vector<30x12xf32>
    %cst_20 = arith.constant 1.000000e+00 : f32
    %45 = vector.broadcast %cst_20 : f32 to vector<30x12xf32>
    %46 = arith.addf %45, %44 : vector<30x12xf32>
    %47 = arith.divf %45, %46 : vector<30x12xf32>
    %48 = vector.extract_strided_slice %7 {offsets = [30, 0], sizes = [30, 12], strides = [1, 1]} : vector<150x12xf32> to vector<30x12xf32>
    %cst_21 = arith.constant dense<0.000000e+00> : vector<30x12xf32>
    %49 = tpu.matmul %39, %10, %cst_21 {dimension_numbers = #tpu.dot_dimension_numbers<[1], [0], [0], [1], [0, 0, 1, 1], [], []>} : vector<30x12xf32>, vector<12x12xf32>, vector<30x12xf32> -> vector<30x12xf32>
    %50 = arith.addf %48, %49 : vector<30x12xf32>
    %51 = arith.negf %50 : vector<30x12xf32>
    %52 = math.exp %51 : vector<30x12xf32>
    %cst_22 = arith.constant 1.000000e+00 : f32
    %53 = vector.broadcast %cst_22 : f32 to vector<30x12xf32>
    %54 = arith.addf %53, %52 : vector<30x12xf32>
    %55 = arith.divf %53, %54 : vector<30x12xf32>
    %56 = vector.extract_strided_slice %8 {offsets = [30, 0], sizes = [30, 12], strides = [1, 1]} : vector<150x12xf32> to vector<30x12xf32>
    %cst_23 = arith.constant dense<0.000000e+00> : vector<30x12xf32>
    %57 = tpu.matmul %39, %11, %cst_23 {dimension_numbers = #tpu.dot_dimension_numbers<[1], [0], [0], [1], [0, 0, 1, 1], [], []>} : vector<30x12xf32>, vector<12x12xf32>, vector<30x12xf32> -> vector<30x12xf32>
    %58 = vector.broadcast %12 : vector<1x12xf32> to vector<30x12xf32>
    %59 = arith.addf %57, %58 : vector<30x12xf32>
    %60 = arith.mulf %47, %59 : vector<30x12xf32>
    %61 = arith.addf %56, %60 : vector<30x12xf32>
    %62 = math.tanh %61 : vector<30x12xf32>
    %63 = arith.subf %39, %62 : vector<30x12xf32>
    %64 = arith.mulf %55, %63 : vector<30x12xf32>
    %65 = arith.addf %62, %64 : vector<30x12xf32>
    %66 = vector.extract_strided_slice %6 {offsets = [60, 0], sizes = [30, 12], strides = [1, 1]} : vector<150x12xf32> to vector<30x12xf32>
    %cst_24 = arith.constant dense<0.000000e+00> : vector<30x12xf32>
    %67 = tpu.matmul %65, %9, %cst_24 {dimension_numbers = #tpu.dot_dimension_numbers<[1], [0], [0], [1], [0, 0, 1, 1], [], []>} : vector<30x12xf32>, vector<12x12xf32>, vector<30x12xf32> -> vector<30x12xf32>
    %68 = arith.addf %66, %67 : vector<30x12xf32>
    %69 = arith.negf %68 : vector<30x12xf32>
    %70 = math.exp %69 : vector<30x12xf32>
    %cst_25 = arith.constant 1.000000e+00 : f32
    %71 = vector.broadcast %cst_25 : f32 to vector<30x12xf32>
    %72 = arith.addf %71, %70 : vector<30x12xf32>
    %73 = arith.divf %71, %72 : vector<30x12xf32>
    %74 = vector.extract_strided_slice %7 {offsets = [60, 0], sizes = [30, 12], strides = [1, 1]} : vector<150x12xf32> to vector<30x12xf32>
    %cst_26 = arith.constant dense<0.000000e+00> : vector<30x12xf32>
    %75 = tpu.matmul %65, %10, %cst_26 {dimension_numbers = #tpu.dot_dimension_numbers<[1], [0], [0], [1], [0, 0, 1, 1], [], []>} : vector<30x12xf32>, vector<12x12xf32>, vector<30x12xf32> -> vector<30x12xf32>
    %76 = arith.addf %74, %75 : vector<30x12xf32>
    %77 = arith.negf %76 : vector<30x12xf32>
    %78 = math.exp %77 : vector<30x12xf32>
    %cst_27 = arith.constant 1.000000e+00 : f32
    %79 = vector.broadcast %cst_27 : f32 to vector<30x12xf32>
    %80 = arith.addf %79, %78 : vector<30x12xf32>
    %81 = arith.divf %79, %80 : vector<30x12xf32>
    %82 = vector.extract_strided_slice %8 {offsets = [60, 0], sizes = [30, 12], strides = [1, 1]} : vector<150x12xf32> to vector<30x12xf32>
    %cst_28 = arith.constant dense<0.000000e+00> : vector<30x12xf32>
    %83 = tpu.matmul %65, %11, %cst_28 {dimension_numbers = #tpu.dot_dimension_numbers<[1], [0], [0], [1], [0, 0, 1, 1], [], []>} : vector<30x12xf32>, vector<12x12xf32>, vector<30x12xf32> -> vector<30x12xf32>
    %84 = vector.broadcast %12 : vector<1x12xf32> to vector<30x12xf32>
    %85 = arith.addf %83, %84 : vector<30x12xf32>
    %86 = arith.mulf %73, %85 : vector<30x12xf32>
    %87 = arith.addf %82, %86 : vector<30x12xf32>
    %88 = math.tanh %87 : vector<30x12xf32>
    %89 = arith.subf %65, %88 : vector<30x12xf32>
    %90 = arith.mulf %81, %89 : vector<30x12xf32>
    %91 = arith.addf %88, %90 : vector<30x12xf32>
    %92 = vector.extract_strided_slice %6 {offsets = [90, 0], sizes = [30, 12], strides = [1, 1]} : vector<150x12xf32> to vector<30x12xf32>
    %cst_29 = arith.constant dense<0.000000e+00> : vector<30x12xf32>
    %93 = tpu.matmul %91, %9, %cst_29 {dimension_numbers = #tpu.dot_dimension_numbers<[1], [0], [0], [1], [0, 0, 1, 1], [], []>} : vector<30x12xf32>, vector<12x12xf32>, vector<30x12xf32> -> vector<30x12xf32>
    %94 = arith.addf %92, %93 : vector<30x12xf32>
    %95 = arith.negf %94 : vector<30x12xf32>
    %96 = math.exp %95 : vector<30x12xf32>
    %cst_30 = arith.constant 1.000000e+00 : f32
    %97 = vector.broadcast %cst_30 : f32 to vector<30x12xf32>
    %98 = arith.addf %97, %96 : vector<30x12xf32>
    %99 = arith.divf %97, %98 : vector<30x12xf32>
    %100 = vector.extract_strided_slice %7 {offsets = [90, 0], sizes = [30, 12], strides = [1, 1]} : vector<150x12xf32> to vector<30x12xf32>
    %cst_31 = arith.constant dense<0.000000e+00> : vector<30x12xf32>
    %101 = tpu.matmul %91, %10, %cst_31 {dimension_numbers = #tpu.dot_dimension_numbers<[1], [0], [0], [1], [0, 0, 1, 1], [], []>} : vector<30x12xf32>, vector<12x12xf32>, vector<30x12xf32> -> vector<30x12xf32>
    %102 = arith.addf %100, %101 : vector<30x12xf32>
    %103 = arith.negf %102 : vector<30x12xf32>
    %104 = math.exp %103 : vector<30x12xf32>
    %cst_32 = arith.constant 1.000000e+00 : f32
    %105 = vector.broadcast %cst_32 : f32 to vector<30x12xf32>
    %106 = arith.addf %105, %104 : vector<30x12xf32>
    %107 = arith.divf %105, %106 : vector<30x12xf32>
    %108 = vector.extract_strided_slice %8 {offsets = [90, 0], sizes = [30, 12], strides = [1, 1]} : vector<150x12xf32> to vector<30x12xf32>
    %cst_33 = arith.constant dense<0.000000e+00> : vector<30x12xf32>
    %109 = tpu.matmul %91, %11, %cst_33 {dimension_numbers = #tpu.dot_dimension_numbers<[1], [0], [0], [1], [0, 0, 1, 1], [], []>} : vector<30x12xf32>, vector<12x12xf32>, vector<30x12xf32> -> vector<30x12xf32>
    %110 = vector.broadcast %12 : vector<1x12xf32> to vector<30x12xf32>
    %111 = arith.addf %109, %110 : vector<30x12xf32>
    %112 = arith.mulf %99, %111 : vector<30x12xf32>
    %113 = arith.addf %108, %112 : vector<30x12xf32>
    %114 = math.tanh %113 : vector<30x12xf32>
    %115 = arith.subf %91, %114 : vector<30x12xf32>
    %116 = arith.mulf %107, %115 : vector<30x12xf32>
    %117 = arith.addf %114, %116 : vector<30x12xf32>
    %118 = vector.extract_strided_slice %6 {offsets = [120, 0], sizes = [30, 12], strides = [1, 1]} : vector<150x12xf32> to vector<30x12xf32>
    %cst_34 = arith.constant dense<0.000000e+00> : vector<30x12xf32>
    %119 = tpu.matmul %117, %9, %cst_34 {dimension_numbers = #tpu.dot_dimension_numbers<[1], [0], [0], [1], [0, 0, 1, 1], [], []>} : vector<30x12xf32>, vector<12x12xf32>, vector<30x12xf32> -> vector<30x12xf32>
    %120 = arith.addf %118, %119 : vector<30x12xf32>
    %121 = arith.negf %120 : vector<30x12xf32>
    %122 = math.exp %121 : vector<30x12xf32>
    %cst_35 = arith.constant 1.000000e+00 : f32
    %123 = vector.broadcast %cst_35 : f32 to vector<30x12xf32>
    %124 = arith.addf %123, %122 : vector<30x12xf32>
    %125 = arith.divf %123, %124 : vector<30x12xf32>
    %126 = vector.extract_strided_slice %7 {offsets = [120, 0], sizes = [30, 12], strides = [1, 1]} : vector<150x12xf32> to vector<30x12xf32>
    %cst_36 = arith.constant dense<0.000000e+00> : vector<30x12xf32>
    %127 = tpu.matmul %117, %10, %cst_36 {dimension_numbers = #tpu.dot_dimension_numbers<[1], [0], [0], [1], [0, 0, 1, 1], [], []>} : vector<30x12xf32>, vector<12x12xf32>, vector<30x12xf32> -> vector<30x12xf32>
    %128 = arith.addf %126, %127 : vector<30x12xf32>
    %129 = arith.negf %128 : vector<30x12xf32>
    %130 = math.exp %129 : vector<30x12xf32>
    %cst_37 = arith.constant 1.000000e+00 : f32
    %131 = vector.broadcast %cst_37 : f32 to vector<30x12xf32>
    %132 = arith.addf %131, %130 : vector<30x12xf32>
    %133 = arith.divf %131, %132 : vector<30x12xf32>
    %134 = vector.extract_strided_slice %8 {offsets = [120, 0], sizes = [30, 12], strides = [1, 1]} : vector<150x12xf32> to vector<30x12xf32>
    %cst_38 = arith.constant dense<0.000000e+00> : vector<30x12xf32>
    %135 = tpu.matmul %117, %11, %cst_38 {dimension_numbers = #tpu.dot_dimension_numbers<[1], [0], [0], [1], [0, 0, 1, 1], [], []>} : vector<30x12xf32>, vector<12x12xf32>, vector<30x12xf32> -> vector<30x12xf32>
    %136 = vector.broadcast %12 : vector<1x12xf32> to vector<30x12xf32>
    %137 = arith.addf %135, %136 : vector<30x12xf32>
    %138 = arith.mulf %125, %137 : vector<30x12xf32>
    %139 = arith.addf %134, %138 : vector<30x12xf32>
    %140 = math.tanh %139 : vector<30x12xf32>
    %141 = arith.subf %117, %140 : vector<30x12xf32>
    %142 = arith.mulf %133, %141 : vector<30x12xf32>
    %143 = arith.addf %140, %142 : vector<30x12xf32>
    %c0_39 = arith.constant 0 : index
    %c0_40 = arith.constant 0 : index
    %144 = vector.load %arg7[%c0_39, %c0_40] : memref<30x12xf32, #tpu.memory_space<vmem>>, vector<30x12xf32>
    tpu.vector_store %arg7[%c0_39, %c0_40], %143 {strides = array<i32>} : memref<30x12xf32, #tpu.memory_space<vmem>>, vector<30x12xf32>,
    return
  }
}

</mosaic_0001>

<bundles_post_ra>
// kernel: tpu_custom_call.1
= control target key start
LH: loop header
LB: loop body
LE: loop exit
PB: predicated region body
PF: predicated region fallthrough
CT: control target
= control target key end

     0   :  { %vm112_vm0 = vcmask 1041408   ;;  %vm287_vm1 = vcmask 1043456   ;;  %v3491_v0 = vmov 0.0|0.0   ;;  %vm3492_vm2 = vmmov 1   ;;  %s3495_s25 = smov 24   ;;  %s3496_s26 = smov 12   ;;  %s4373_s1 = inlined_call_operand.vmem [shape: f32[10,36], index: 1, kind: input, shape index: {}]   ;;  %s4374_s3 = inlined_call_operand.vmem [shape: f32[12,12], index: 3, kind: input, shape index: {}]   ;;  %s4375_s0 = inlined_call_operand.vmem [shape: f32[150,10], index: 0, kind: input, shape index: {}]   ;;  %s4376_s4 = inlined_call_operand.vmem [shape: f32[12,12], index: 4, kind: input, shape index: {}]   ;;  %s4377_s5 = inlined_call_operand.vmem [shape: f32[12,12], index: 5, kind: input, shape index: {}]   ;;  %s4378_s2 = inlined_call_operand.vmem [shape: f32[1,36], index: 2, kind: input, shape index: {}]   ;;  %s4379_s6 = inlined_call_operand.vmem [shape: f32[1,12], index: 6, kind: input, shape index: {}]   ;;  %s4380_s7 = inlined_call_operand.vmem [shape: f32[30,12], index: 7, kind: output, shape index: {}]  }
   0x1   :  { %3167 = vmatprep.subr.bf16.mxu0 %v3491_v0  ;;  %v45_v1 = vld [vmem:[%s4373_s1] sm:$0xff]  ;;  %v46_v2 = vld [vmem:[%s4373_s1 + $0x8] sm:$0x3]  ;;  %vm3169_vm3 = vmpackc.low %vm112_vm0, %vm3492_vm2  ;;  %vm3493_vm5 = vmmov 0   ;;  %v3494_v7 = vmov 0.0   ;;  %vm54_vm6 = vcmask 80896  }
   0x2   :  { %v3168_v3 = vpack.c.bf16 %v46_v2, %v45_v1  ;;  %vm3547_vm4 = vmpackc.low %vm287_vm1, %vm3492_vm2  ;;  %v276_v5 = vld [vmem:[%s4374_s3] sm:$0xff]  ;;  %v277_v6 = vld [vmem:[%s4374_s3 + $0x8] sm:$0xf]  ;;  %2960 = vmatprep.mubr.msk.f32.mxu0 %vm3493_vm5, %v3494_v7  ;;  %3021 = vmatprep.mubr.f32.mxu1 %v3494_v7  ;;  %s3497_s27 = smov 116   ;;  %s3498_s3 = smov 104   ;;  %vm283_vm7 = vcmask 97280  }
   0x3   :  { %v3560_v8 = vpack.c.bf16 %v277_v6, %v276_v5  ;;  %v26_v9 = vld [vmem:[%s4375_s0] sm:$0xff]  ;;  %v279_v11 = vld [vmem:[%s4376_s4 + $0x8] sm:$0xf]  ;;  %v28_v17 = vld [vmem:[%s4375_s0 + $0x10] sm:$0xff]  ;;  %vm811_vm8 = vcmask 1045504   ;;  %vm2710_vm9 = vcmask 95232  }
   0x4   :  { %3170 = vmatpush3.bf16.msk.msra.mxu0 %vm3169_vm3, %v3168_v3  ;;  %v278_v10 = vld [vmem:[%s4376_s4] sm:$0xff]  ;;  %v281_v14 = vld [vmem:[%s4377_s5 + $0x8] sm:$0xf]  ;;  %v29_v18 = vld [vmem:[%s4375_s0 + $0x18] sm:$0xff] }
   0x5   :  { %3173 = vmatprep.subr.msk.bf16.mxu1 %vm3547_vm4, %v3560_v8  ;;  %v3574_v12 = vpack.c.bf16 %v279_v11, %v278_v10  ;;  %v280_v13 = vld [vmem:[%s4377_s5] sm:$0xff]  ;;  %v27_v16 = vld [vmem:[%s4375_s0 + $0x8] sm:$0xff] }
   0x6   :  { %3176 = vmatpush3.bf16.msk.msra.mxu1 %vm3547_vm4, %v3560_v8  ;;  %v3589_v15 = vpack.c.bf16 %v281_v14, %v280_v13  ;;  %v3652_v19 = vld [vmem:[%s4378_s2] ss:$0 sm:$0xff] }
   0x7   :  { %2961 = vmatmul.mubr.msk.f32.vlgmr.msra.gmra.mrb[0].mxu0 %vm54_vm6, %v26_v9  ;;  %3179 = vmatprep.subr.msk.bf16.mxu1 %vm3547_vm4, %v3574_v12  ;;  %v3673_v57 = vld [vmem:[%s4379_s6] ss:$0 sm:$0xff] }
   0x8   :  { %2963 = vmatprep.mubr.msk.f32.mxu0 %vm3493_vm5, %v3494_v7  ;;  %3233 = vmatprep.subr.msk.bf16.mxu0 %vm3547_vm4, %v3574_v12 }
   0x9   :  { %3022 = vmatmul.mubr.f32.vlgmr.msra.gmra.mrb[0].mxu1 %v3494_v7  ;;  %3236 = vmatpush3.bf16.msk.msra.mxu0 %vm3547_vm4, %v3574_v12 }
   0xa   :  { %3024 = vmatprep.mubr.f32.mxu1 %v3494_v7  ;;  %3182 = vmatpush3.bf16.msk.msra.mxu1 %vm3547_vm4, %v3574_v12 }
   0xb   :  { %2964 = vmatmul.mubr.msk.f32.gmra.mrb[2].mxu0 %vm54_vm6, %v27_v16  ;;  %3185 = vmatprep.subr.msk.bf16.mxu1 %vm3547_vm4, %v3589_v15 }
   0xc   :  { %2966 = vmatprep.mubr.msk.f32.mxu0 %vm3493_vm5, %v3494_v7  ;;  %3245 = vmatprep.subr.msk.bf16.mxu0 %vm3547_vm4, %v3560_v8 }
   0xd   :  { %3025 = vmatmul.mubr.f32.gmra.mrb[2].mxu1 %v3494_v7 }
   0xe   :  { %3031 = vmatprep.mubr.f32.mxu1 %v3494_v7 }
   0xf   :  { %2967 = vmatmul.mubr.msk.f32.gmra.mrb[4].mxu0 %vm54_vm6, %v28_v17 }
  0x10   :  { %2969 = vmatprep.mubr.msk.f32.mxu0 %vm3493_vm5, %v3494_v7 }
  0x11   :  { %3032 = vmatmul.mubr.f32.vlgmr.msra.gmra.mrb[4].mxu1 %v3494_v7 }
  0x12   :  { %3034 = vmatprep.mubr.f32.mxu1 %v3494_v7  ;;  %3188 = vmatpush3.bf16.msk.msra.mxu1 %vm3547_vm4, %v3589_v15 }
  0x13   :  { %2970 = vmatmul.mubr.msk.f32.gmra.mrb[6].mxu0 %vm54_vm6, %v29_v18  ;;  %3191 = vmatprep.subr.msk.bf16.mxu1 %vm3547_vm4, %v3560_v8 }
  0x14   :  { %2972 = vmatprep.mubr.msk.f32.mxu0 %vm3493_vm5, %v3494_v7 }
  0x15   :  { %3035 = vmatmul.mubr.f32.gmra.mrb[6].mxu1 %v3494_v7 }
  0x16   :  { %3041 = vmatprep.mubr.f32.mxu1 %v3494_v7 }
  0x19   :  { %3042 = vmatmul.mubr.f32.vlgmr.msra.gmra.mrb[8].mxu1 %v3494_v7 }
  0x1a   :  { %3044 = vmatprep.mubr.f32.mxu1 %v3494_v7  ;;  %3194 = vmatpush3.bf16.msk.msra.mxu1 %vm3547_vm4, %v3560_v8 }
  0x1b   :  { %3197 = vmatprep.subr.msk.bf16.mxu1 %vm3547_vm4, %v3574_v12 }
  0x1d   :  { %3045 = vmatmul.mubr.f32.gmra.mrb[10].mxu1 %v3494_v7 }
  0xda   :  { %v182_v20 = vpop.f32.mrb[0].mxu0 }
  0xdb   :  { %v3655_v21 = vadd.f32 %v3652_v19, %v182_v20  ;;  %v2962_v22 = vpop.f32.mrb[1].mxu0 }
  0xdc   :  { %v3023_v23 = vpop.f32.mrb[0].mxu1 }
  0xdd   :  { %v357_v24 = vpop.f32.mrb[1].mxu1 }
  0xde   :  { %v376_v25 = vadd.f32 %v357_v24, %v3655_v21  ;;  %v187_v26 = vpop.f32.mrb[2].mxu0 }
  0xdf   :  { %v3659_v27 = vadd.f32 %v3652_v19, %v187_v26  ;;  %v2965_v28 = vpop.f32.mrb[3].mxu0 }
  0xe0   :  { %v2738_v29 = vmul.f32 -1.442695, %v376_v25  ;;  %v3026_v30 = vpop.f32.mrb[2].mxu1 }
  0xe1   :  { %v377_v31 = vadd.f32 %v3023_v23, %v3659_v27  ;;  %v367_v32 = vpop.f32.mrb[3].mxu1 }
  0xe2   :  { %3269 = vpow2.f32 %v2738_v29  ;;  %v192_v33 = vpop.f32.mrb[4].mxu0 }
  0xe3   :  { %v2739_v34 = vmul.f32 -1.442695, %v377_v31  ;;  %v3663_v35 = vadd.f32 %v3652_v19, %v192_v33  ;;  %v2968_v36 = vpop.f32.mrb[5].mxu0 }
  0xe4   :  { %v3033_v37 = vpop.f32.mrb[4].mxu1 }
  0xe5   :  { %3271 = vpow2.f32 %v2739_v34  ;;  %v378_v38 = vadd.f32 %v367_v32, %v3663_v35  ;;  %v473_v39 = vpop.f32.mrb[5].mxu1 }
  0xe6   :  { %v197_v40 = vpop.f32.mrb[6].mxu0 }
  0xe7   :  { %v2740_v41 = vmul.f32 -1.442695, %v378_v38  ;;  %v3667_v42 = vadd.f32 %v3652_v19, %v197_v40  ;;  %v2971_v43 = vpop.f32.mrb[7].mxu0 }
  0xe8   :  { %v3036_v44 = vpop.f32.mrb[6].mxu1 }
  0xe9   :  { %3273 = vpow2.f32 %v2740_v41  ;;  %v483_v45 = vpop.f32.mrb[7].mxu1  ;;  %v379_v46 = vadd.f32 %v3026_v30, %v3667_v42 }
  0xeb   :  { %v2741_v47 = vmul.f32 -1.442695, %v379_v46 }
  0xec   :  { %v3270_v48 = vpop.eup %3269  ;;  %v3043_v49 = vpop.f32.mrb[8].mxu1 }
  0xed   :  { %v392_v50 = vadd.f32 1.0, %v3270_v48  ;;  %v611_v51 = vpop.f32.mrb[9].mxu1  ;;  %3275 = vpow2.f32 %v2741_v47  ;;  %v617_v63 = vadd.f32 %v3043_v49, %v3673_v57 }
  0xee   :  { %v612_v59 = vadd.f32 %v3673_v57, %v611_v51 }
  0xef   :  { %v3272_v52 = vpop.eup %3271  ;;  %3277 = vrcp.f32 %v392_v50 }
  0xf0   :  { %v393_v53 = vadd.f32 1.0, %v3272_v52  ;;  %v3046_v54 = vpop.f32.mrb[10].mxu1 }
  0xf1   :  { %v621_v55 = vpop.f32.mrb[11].mxu1  ;;  %v627_v9 = vadd.f32 %v3046_v54, %v3673_v57 }
  0xf2   :  { %3279 = vrcp.f32 %v393_v53  ;;  %v622_v3 = vadd.f32 %v3673_v57, %v621_v55 }
  0xf3   :  { %v3274_v56 = vpop.eup %3273 }
  0xf4   :  { %v394_v58 = vadd.f32 1.0, %v3274_v56 }
  0xf6   :  { %3281 = vrcp.f32 %v394_v58 }
  0xf7   :  { %v3276_v60 = vpop.eup %3275 }
  0xf8   :  { %v395_v61 = vadd.f32 1.0, %v3276_v60 }
  0xf9   :  { %v3278_v62 = vpop.eup %3277 }
  0xfa   :  { %v630_v0 = vmul.f32 %v3278_v62, %v612_v59  ;;  %3283 = vrcp.f32 %v395_v61 }
  0xfc   :  { %v3280_v1 = vpop.eup %3279  ;;  %638 = vrot.lane.b32.xlu0 %v630_v0, %s3495_s25 }
  0xfd   :  { %v631_v2 = vmul.f32 %v3280_v1, %v617_v63  ;;  %v30_v1 = vld [vmem:[%s4375_s0 + $0x20] sm:$0xff] }
  0xfe   :  { %2973 = vmatmul.mubr.msk.f32.gmra.mrb[8].mxu0 %vm54_vm6, %v30_v1 }
  0xff   :  { %2975 = vmatprep.mubr.msk.f32.mxu0 %vm3493_vm5, %v3494_v7 }
 0x100   :  { %v3282_v5 = vpop.eup %3281  ;;  %640 = vrot.lane.b32.xlu0 %v631_v2, %s3495_s25  ;;  %v31_v2 = vld [vmem:[%s4375_s0 + $0x28] sm:$0xff] }
 0x101   :  { %v632_v6 = vmul.f32 %v3282_v5, %v622_v3  ;;  %v32_v3 = vld [vmem:[%s4375_s0 + $0x30] sm:$0xff] }
 0x102   :  { %2976 = vmatmul.mubr.msk.f32.gmra.mrb[10].mxu0 %vm54_vm6, %v31_v2 }
 0x103   :  { %642 = vrot.lane.b32.xlu1 %v632_v6, %s3495_s25  ;;  %2978 = vmatprep.mubr.msk.f32.mxu0 %vm3493_vm5, %v3494_v7  ;;  %v33_v6 = vld [vmem:[%s4375_s0 + $0x38] sm:$0xff] }
 0x104   :  { %v3284_v10 = vpop.eup %3283  ;;  %496 = vrot.lane.b32.xlu0 %v473_v39, %s3496_s26 }
 0x105   :  { %v633_v11 = vmul.f32 %v3284_v10, %v627_v9 }
 0x106   :  { %2979 = vmatmul.mubr.msk.f32.gmra.mrb[12].mxu0 %vm54_vm6, %v32_v3 }
 0x107   :  { %644 = vrot.lane.b32.xlu1 %v633_v11, %s3495_s25  ;;  %2981 = vmatprep.mubr.msk.f32.mxu0 %vm3493_vm5, %v3494_v7 }
 0x108   :  { %500 = vrot.lane.b32.xlu0 %v483_v45, %s3496_s26 }
 0x10a   :  { %2982 = vmatmul.mubr.msk.f32.gmra.mrb[14].mxu0 %vm54_vm6, %v33_v6 }
 0x10b   :  { %498 = vrot.lane.b32.xlu1 %v3033_v37, %s3496_s26  ;;  %2984 = vmatprep.mubr.msk.f32.mxu0 %vm3493_vm5, %v3494_v7 }
 0x10f   :  { %502 = vrot.lane.b32.xlu1 %v3036_v44, %s3496_s26 }
 0x16e   :  { %v639_v13 = vpop.permute.xlu0 %638 }
 0x16f   :  { %v650_v14 = vadd.f32 %v639_v13, %v3655_v21 }
 0x171   :  { %3285 = vtanh.f32 %v650_v14 }
 0x172   :  { %v641_v16 = vpop.permute.xlu0 %640 }
 0x173   :  { %v651_v17 = vadd.f32 %v641_v16, %v3659_v27 }
 0x175   :  { %3287 = vtanh.f32 %v651_v17  ;;  %v643_v18 = vpop.permute.xlu1 %642 }
 0x176   :  { %v652_v20 = vadd.f32 %v643_v18, %v3663_v35  ;;  %v497_v33 = vpop.permute.xlu0 %496 }
 0x177   :  { %v508_v34 = vadd.f32 %v497_v33, %v3655_v21 }
 0x178   :  { %3289 = vtanh.f32 %v652_v20 }
 0x179   :  { %v645_v22 = vpop.permute.xlu1 %644  ;;  %v2743_v37 = vmul.f32 -1.442695, %v508_v34 }
 0x17a   :  { %v653_v23 = vadd.f32 %v645_v22, %v3667_v42  ;;  %v501_v38 = vpop.permute.xlu0 %500 }
 0x17b   :  { %v3691_v24 = vpop.eup %3285  ;;  %v510_v40 = vadd.f32 %v501_v38, %v3663_v35 }
 0x17c   :  { %3291 = vtanh.f32 %v653_v23  ;;  %v658_v25 = vsub.f32 0.0, %v3691_v24 }
 0x17d   :  { %v499_v36 = vpop.permute.xlu1 %498  ;;  %3293 = vpow2.f32 %v2743_v37  ;;  %v2745_v44 = vmul.f32 -1.442695, %v510_v40 }
 0x17e   :  { %666 = vrot.lane.b32.xlu0 %v658_v25, %s3497_s27  ;;  %v509_v39 = vadd.f32 %v499_v36, %v3659_v27 }
 0x17f   :  { %v3695_v26 = vpop.eup %3287 }
 0x180   :  { %v659_v28 = vsub.f32 0.0, %v3695_v26  ;;  %v2744_v41 = vmul.f32 -1.442695, %v509_v39 }
 0x181   :  { %v503_v43 = vpop.permute.xlu1 %502 }
 0x182   :  { %v3698_v29 = vpop.eup %3289  ;;  %668 = vrot.lane.b32.xlu1 %v659_v28, %s3497_s27  ;;  %v511_v45 = vadd.f32 %v503_v43, %v3667_v42  ;;  %3295 = vpow2.f32 %v2744_v41 }
 0x183   :  { %v660_v30 = vsub.f32 0.0, %v3698_v29  ;;  %3297 = vpow2.f32 %v2745_v44 }
 0x184   :  { %v2746_v46 = vmul.f32 -1.442695, %v511_v45 }
 0x185   :  { %670 = vrot.lane.b32.xlu0 %v660_v30, %s3497_s27 }
 0x186   :  { %v3703_v31 = vpop.eup %3291  ;;  %3299 = vpow2.f32 %v2746_v46 }
 0x187   :  { %v661_v32 = vsub.f32 0.0, %v3703_v31  ;;  %v3294_v47 = vpop.eup %3293 }
 0x188   :  { %v524_v48 = vadd.f32 1.0, %v3294_v47 }
 0x189   :  { %672 = vrot.lane.b32.xlu1 %v661_v32, %s3497_s27 }
 0x18a   :  { %3301 = vrcp.f32 %v524_v48 }
 0x18c   :  { %v3296_v21 = vpop.eup %3295 }
 0x18d   :  { %v3298_v49 = vpop.eup %3297  ;;  %v525_v50 = vadd.f32 1.0, %v3296_v21 }
 0x18e   :  { %v526_v51 = vadd.f32 1.0, %v3298_v49 }
 0x18f   :  { %3303 = vrcp.f32 %v525_v50 }
 0x190   :  { %v3300_v27 = vpop.eup %3299  ;;  %3305 = vrcp.f32 %v526_v51 }
 0x191   :  { %v527_v35 = vadd.f32 1.0, %v3300_v27 }
 0x193   :  { %3307 = vrcp.f32 %v527_v35 }
 0x194   :  { %v3302_v52 = vpop.eup %3301 }
 0x199   :  { %v3304_v55 = vpop.eup %3303 }
 0x19a   :  { %v3306_v59 = vpop.eup %3305 }
 0x19d   :  { %v3308_v62 = vpop.eup %3307 }
 0x1f0   :  { %v667_v53 = vpop.permute.xlu0 %666 }
 0x1f1   :  { %v678_v54 = vmul.f32 %v3302_v52, %v667_v53 }
 0x1f3   :  { %686 = vrot.lane.b32.xlu0 %v678_v54, %s3496_s26 }
 0x1f4   :  { %v669_v56 = vpop.permute.xlu1 %668 }
 0x1f5   :  { %v679_v58 = vmul.f32 %v3304_v55, %v669_v56 }
 0x1f7   :  { %688 = vrot.lane.b32.xlu1 %v679_v58, %s3496_s26  ;;  %v671_v60 = vpop.permute.xlu0 %670 }
 0x1f8   :  { %v680_v61 = vmul.f32 %v3306_v59, %v671_v60 }
 0x1fa   :  { %690 = vrot.lane.b32.xlu0 %v680_v61, %s3496_s26 }
 0x1fb   :  { %v673_v63 = vpop.permute.xlu1 %672 }
 0x1fc   :  { %v681_v0 = vmul.f32 %v3308_v62, %v673_v63 }
 0x1fe   :  { %692 = vrot.lane.b32.xlu1 %v681_v0, %s3496_s26 }
 0x265   :  { %v687_v5 = vpop.permute.xlu0 %686 }
 0x266   :  { %v3737_v9 = vadd.f32 %v3691_v24, %v687_v5  ;;  %v202_v24 = vpop.f32.mrb[8].mxu0 }
 0x267   :  { %v2974_v25 = vpop.f32.mrb[9].mxu0  ;;  %v3790_v36 = vadd.f32 %v3652_v19, %v202_v24 }
 0x268   :  { %706 = vrot.lane.b32.xlu0 %v3737_v9, %s3498_s3 }
 0x269   :  { %v689_v10 = vpop.permute.xlu1 %688 }
 0x26a   :  { %v3745_v11 = vadd.f32 %v3695_v26, %v689_v10  ;;  %v207_v26 = vpop.f32.mrb[10].mxu0 }
 0x26b   :  { %v2977_v28 = vpop.f32.mrb[11].mxu0  ;;  %v3802_v50 = vadd.f32 %v3652_v19, %v207_v26 }
 0x26c   :  { %708 = vrot.lane.b32.xlu1 %v3745_v11, %s3498_s3  ;;  %v691_v13 = vpop.permute.xlu0 %690 }
 0x26d   :  { %v3750_v14 = vadd.f32 %v3698_v29, %v691_v13  ;;  %v212_v29 = vpop.f32.mrb[12].mxu0 }
 0x26e   :  { %v2980_v30 = vpop.f32.mrb[13].mxu0  ;;  %v3799_v47 = vadd.f32 %v3652_v19, %v212_v29 }
 0x26f   :  { %710 = vrot.lane.b32.xlu0 %v3750_v14, %s3498_s3 }
 0x270   :  { %v693_v16 = vpop.permute.xlu1 %692 }
 0x271   :  { %v3755_v17 = vadd.f32 %v3703_v31, %v693_v16  ;;  %v217_v31 = vpop.f32.mrb[14].mxu0 }
 0x272   :  { %v2983_v32 = vpop.f32.mrb[15].mxu0  ;;  %v3796_v44 = vadd.f32 %v3652_v19, %v217_v31 }
 0x273   :  { %712 = vrot.lane.b32.xlu1 %v3755_v17, %s3498_s3 }
 0x2da   :  { %v707_v18 = vpop.permute.xlu0 %706 }
 0x2db   :  { %3051 = vmatprep.mubr.msk.f32.mxu1 %vm283_vm7, %v707_v18 }
 0x2de   :  { %v709_v20 = vpop.permute.xlu1 %708 }
 0x2df   :  { %3052 = vmatmul.mubr.msk.f32.vlgmr.msra.gmra.mrb[12].mxu1 %vm283_vm7, %v709_v20 }
 0x2e0   :  { %3200 = vmatpush3.bf16.msk.msra.mxu1 %vm3547_vm4, %v3574_v12 }
 0x2e1   :  { %v711_v22 = vpop.permute.xlu0 %710  ;;  %3203 = vmatprep.subr.msk.bf16.mxu1 %vm3547_vm4, %v3589_v15 }
 0x2e2   :  { %3054 = vmatprep.mubr.msk.f32.mxu1 %vm283_vm7, %v711_v22 }
 0x2e5   :  { %v713_v23 = vpop.permute.xlu1 %712 }
 0x2e6   :  { %3055 = vmatmul.mubr.msk.f32.gmra.mrb[14].mxu1 %vm283_vm7, %v713_v23 }
 0x2e7   :  { %3061 = vmatprep.mubr.msk.f32.mxu1 %vm283_vm7, %v707_v18 }
 0x2ea   :  { %3062 = vmatmul.mubr.msk.f32.vlgmr.msra.gmra.mrb[16].mxu1 %vm283_vm7, %v709_v20 }
 0x2eb   :  { %3064 = vmatprep.mubr.msk.f32.mxu1 %vm283_vm7, %v711_v22  ;;  %3206 = vmatpush3.bf16.msk.msra.mxu1 %vm3547_vm4, %v3589_v15 }
 0x2ec   :  { %3209 = vmatprep.subr.msk.bf16.mxu1 %vm3547_vm4, %v3560_v8 }
 0x2ee   :  { %3065 = vmatmul.mubr.msk.f32.gmra.mrb[18].mxu1 %vm283_vm7, %v713_v23 }
 0x2ef   :  { %3071 = vmatprep.mubr.msk.f32.mxu1 %vm283_vm7, %v707_v18 }
 0x2f2   :  { %3072 = vmatmul.mubr.msk.f32.vlgmr.msra.gmra.mrb[20].mxu1 %vm283_vm7, %v709_v20 }
 0x2f3   :  { %3074 = vmatprep.mubr.msk.f32.mxu1 %vm283_vm7, %v711_v22  ;;  %3212 = vmatpush3.bf16.msk.msra.mxu1 %vm3547_vm4, %v3560_v8 }
 0x2f4   :  { %3215 = vmatprep.subr.msk.bf16.mxu1 %vm3547_vm4, %v3574_v12 }
 0x2f6   :  { %3075 = vmatmul.mubr.msk.f32.gmra.mrb[22].mxu1 %vm283_vm7, %v713_v23 }
 0x3b2   :  { %v3053_v33 = vpop.f32.mrb[12].mxu1 }
 0x3b3   :  { %v813_v34 = vrot.slane %v3053_v33, 2  ;;  %v788_v37 = vpop.f32.mrb[13].mxu1 }
 0x3b4   :  { %v812_v38 = vrot.slane %v788_v37, 2 }
 0x3b6   :  { %v814_v39 = vsel %vm811_vm8, %v812_v38, %v813_v34  ;;  %v824_v40 = vadd.f32 %v812_v38, %v3667_v42 }
 0x3b7   :  { %v825_v41 = vadd.f32 %v814_v39, %v3790_v36 }
 0x3b8   :  { %v2754_v43 = vmul.f32 -1.442695, %v824_v40 }
 0x3b9   :  { %v2755_v45 = vmul.f32 -1.442695, %v825_v41  ;;  %v3056_v46 = vpop.f32.mrb[14].mxu1 }
 0x3ba   :  { %3309 = vpow2.f32 %v2754_v43  ;;  %v817_v48 = vrot.slane %v3056_v46, 2  ;;  %v798_v21 = vpop.f32.mrb[15].mxu1 }
 0x3bb   :  { %3311 = vpow2.f32 %v2755_v45  ;;  %v815_v49 = vrot.slane %v798_v21, 2 }
 0x3bc   :  { %v828_v51 = vadd.f32 %v817_v48, %v3796_v44 }
 0x3bd   :  { %v816_v27 = vsel %vm811_vm8, %v813_v34, %v815_v49  ;;  %v818_v35 = vsel %vm811_vm8, %v815_v49, %v817_v48  ;;  %v3063_v52 = vpop.f32.mrb[16].mxu1 }
 0x3be   :  { %v2758_v53 = vmul.f32 -1.442695, %v828_v51  ;;  %v826_v54 = vadd.f32 %v816_v27, %v3802_v50  ;;  %v827_v55 = vadd.f32 %v818_v35, %v3799_v47  ;;  %v949_v56 = vrot.slane %v3063_v52, 2  ;;  %v925_v58 = vpop.f32.mrb[17].mxu1 }
 0x3bf   :  { %v948_v59 = vrot.slane %v925_v58, 2 }
 0x3c0   :  { %3313 = vpow2.f32 %v2758_v53  ;;  %v2756_v60 = vmul.f32 -1.442695, %v826_v54  ;;  %v2757_v61 = vmul.f32 -1.442695, %v827_v55 }
 0x3c1   :  { %v3066_v62 = vpop.f32.mrb[18].mxu1  ;;  %v950_v63 = vsel %vm811_vm8, %v948_v59, %v949_v56 }
 0x3c2   :  { %3315 = vpow2.f32 %v2756_v60  ;;  %v953_v0 = vrot.slane %v3066_v62, 2  ;;  %v935_v1 = vpop.f32.mrb[19].mxu1 }
 0x3c3   :  { %3317 = vpow2.f32 %v2757_v61  ;;  %v951_v2 = vrot.slane %v935_v1, 2 }
 0x3c4   :  { %v3310_v3 = vpop.eup %3309 }
 0x3c5   :  { %v3312_v5 = vpop.eup %3311  ;;  %v844_v6 = vadd.f32 1.0, %v3310_v3  ;;  %v3073_v10 = vpop.f32.mrb[20].mxu1  ;;  %v952_v13 = vsel %vm811_vm8, %v949_v56, %v951_v2  ;;  %v954_v16 = vsel %vm811_vm8, %v951_v2, %v953_v0 }
 0x3c6   :  { %v845_v18 = vadd.f32 1.0, %v3312_v5  ;;  %v1077_v20 = vadd.f32 %v3073_v10, %v3673_v57  ;;  %v1071_v22 = vpop.f32.mrb[21].mxu1 }
 0x3c7   :  { %3319 = vrcp.f32 %v844_v6  ;;  %v1072_v23 = vadd.f32 %v3673_v57, %v1071_v22 }
 0x3c8   :  { %3321 = vrcp.f32 %v845_v18  ;;  %v1095_v24 = vrot.slane %v1077_v20, 2 }
 0x3c9   :  { %v1094_v25 = vrot.slane %v1072_v23, 2  ;;  %v3076_v26 = vpop.f32.mrb[22].mxu1 }
 0x3ca   :  { %v3314_v28 = vpop.eup %3313  ;;  %v1087_v29 = vadd.f32 %v3076_v26, %v3673_v57  ;;  %v1081_v30 = vpop.f32.mrb[23].mxu1 }
 0x3cb   :  { %v848_v31 = vadd.f32 1.0, %v3314_v28  ;;  %v1082_v32 = vadd.f32 %v3673_v57, %v1081_v30  ;;  %v1096_v33 = vsel %vm811_vm8, %v1094_v25, %v1095_v24 }
 0x3cc   :  { %v3316_v34 = vpop.eup %3315  ;;  %v1099_v37 = vrot.slane %v1087_v29, 2 }
 0x3cd   :  { %v3318_v38 = vpop.eup %3317  ;;  %3323 = vrcp.f32 %v848_v31  ;;  %v846_v39 = vadd.f32 1.0, %v3316_v34  ;;  %v1097_v40 = vrot.slane %v1082_v32, 2 }
 0x3ce   :  { %v847_v41 = vadd.f32 1.0, %v3318_v38 }
 0x3cf   :  { %3325 = vrcp.f32 %v846_v39  ;;  %v1098_v43 = vsel %vm811_vm8, %v1095_v24, %v1097_v40  ;;  %v1100_v45 = vsel %vm811_vm8, %v1097_v40, %v1099_v37 }
 0x3d0   :  { %3327 = vrcp.f32 %v847_v41 }
 0x3d1   :  { %v3320_v46 = vpop.eup %3319 }
 0x3d2   :  { %v3322_v48 = vpop.eup %3321  ;;  %v1106_v21 = vmul.f32 %v3320_v46, %v1094_v25 }
 0x3d3   :  { %v1107_v49 = vmul.f32 %v3322_v48, %v1096_v33 }
 0x3d4   :  { %1116 = vrot.lane.b32.xlu0 %v1106_v21, %s3495_s25 }
 0x3d5   :  { %1118 = vrot.lane.b32.xlu1 %v1107_v49, %s3495_s25 }
 0x3d7   :  { %v3324_v51 = vpop.eup %3323 }
 0x3d8   :  { %v1110_v27 = vmul.f32 %v3324_v51, %v1099_v37 }
 0x3d9   :  { %v3326_v35 = vpop.eup %3325 }
 0x3da   :  { %v3328_v52 = vpop.eup %3327  ;;  %v1108_v53 = vmul.f32 %v3326_v35, %v1098_v43 }
 0x3db   :  { %v1109_v54 = vmul.f32 %v3328_v52, %v1100_v45 }
 0x3dc   :  { %1120 = vrot.lane.b32.xlu0 %v1108_v53, %s3495_s25 }
 0x3dd   :  { %1122 = vrot.lane.b32.xlu1 %v1109_v54, %s3495_s25 }
 0x3e0   :  { %1124 = vrot.lane.b32.xlu0 %v1110_v27, %s3495_s25 }
 0x3e1   :  { %955 = vrot.lane.b32.xlu1 %v948_v59, %s3496_s26 }
 0x3e4   :  { %957 = vrot.lane.b32.xlu0 %v950_v63, %s3496_s26 }
 0x3e5   :  { %959 = vrot.lane.b32.xlu1 %v952_v13, %s3496_s26 }
 0x3e8   :  { %961 = vrot.lane.b32.xlu0 %v954_v16, %s3496_s26 }
 0x3e9   :  { %963 = vrot.lane.b32.xlu1 %v953_v0, %s3496_s26 }
 0x446   :  { %v1117_v55 = vpop.permute.xlu0 %1116 }
 0x447   :  { %v1131_v56 = vadd.f32 %v1117_v55, %v3667_v42  ;;  %v1119_v58 = vpop.permute.xlu1 %1118 }
 0x448   :  { %v1132_v60 = vadd.f32 %v1119_v58, %v3790_v36 }
 0x449   :  { %3329 = vtanh.f32 %v1131_v56 }
 0x44a   :  { %3331 = vtanh.f32 %v1132_v60 }
 0x44e   :  { %v1121_v61 = vpop.permute.xlu0 %1120 }
 0x44f   :  { %v1133_v62 = vadd.f32 %v1121_v61, %v3802_v50  ;;  %v1123_v59 = vpop.permute.xlu1 %1122 }
 0x450   :  { %v1134_v63 = vadd.f32 %v1123_v59, %v3799_v47 }
 0x451   :  { %3333 = vtanh.f32 %v1133_v62 }
 0x452   :  { %3335 = vtanh.f32 %v1134_v63  ;;  %v1125_v1 = vpop.permute.xlu0 %1124 }
 0x453   :  { %v3833_v2 = vpop.eup %3329  ;;  %v1135_v0 = vadd.f32 %v1125_v1, %v3796_v44 }
 0x454   :  { %v3836_v3 = vpop.eup %3331  ;;  %v1146_v5 = vrot.slane %v3833_v2, 6 }
 0x455   :  { %3337 = vtanh.f32 %v1135_v0  ;;  %v1147_v6 = vrot.slane %v3836_v3, 6  ;;  %v34_v0 = vld [vmem:[%s4375_s0 + $0x40] sm:$0xff] }
 0x456   :  { %v958_v40 = vpop.permute.xlu0 %957  ;;  %2985 = vmatmul.mubr.msk.f32.gmra.mrb[16].mxu0 %vm54_vm6, %v34_v0 }
 0x457   :  { %v1148_v10 = vsel %vm112_vm0, %v1146_v5, %v1147_v6  ;;  %2987 = vmatprep.mubr.msk.f32.mxu0 %vm3493_vm5, %v3494_v7 }
 0x458   :  { %v1159_v13 = vsub.f32 %v3737_v9, %v1148_v10 }
 0x45a   :  { %v1167_v16 = vrot.slane %v1159_v13, 2  ;;  %v962_v46 = vpop.permute.xlu0 %961 }
 0x45b   :  { %v3842_v18 = vpop.eup %3333  ;;  %v973_v49 = vadd.f32 %v962_v46, %v3799_v47 }
 0x45c   :  { %v3844_v20 = vpop.eup %3335  ;;  %v1149_v22 = vrot.slane %v3842_v18, 6  ;;  %1174 = vrot.lane.b32.xlu0 %v1167_v16, %s3497_s27 }
 0x45d   :  { %v1151_v23 = vrot.slane %v3844_v20, 6  ;;  %v2767_v35 = vmul.f32 -1.442695, %v973_v49 }
 0x45e   :  { %v1150_v24 = vsel %vm112_vm0, %v1147_v6, %v1149_v22 }
 0x45f   :  { %v3850_v25 = vpop.eup %3337  ;;  %v1160_v26 = vsub.f32 %v3745_v11, %v1150_v24  ;;  %v1152_v28 = vsel %vm112_vm0, %v1149_v22, %v1151_v23 }
 0x460   :  { %v1161_v9 = vsub.f32 %v3750_v14, %v1152_v28  ;;  %v1153_v29 = vrot.slane %v3850_v25, 6  ;;  %v956_v14 = vpop.permute.xlu1 %955 }
 0x461   :  { %v1168_v30 = vrot.slane %v1160_v26, 2  ;;  %v970_v39 = vadd.f32 %v956_v14, %v3667_v42 }
 0x462   :  { %v1170_v31 = vrot.slane %v1161_v9, 2  ;;  %v1154_v32 = vsel %vm112_vm0, %v1151_v23, %v1153_v29  ;;  %v36_v29 = vld [vmem:[%s4375_s0 + $0x50] sm:$0xff] }
 0x463   :  { %v1169_v33 = vsel %vm811_vm8, %v1167_v16, %v1168_v30  ;;  %v1162_v34 = vsub.f32 %v3755_v17, %v1154_v32  ;;  %v2764_v41 = vmul.f32 -1.442695, %v970_v39  ;;  %v971_v17 = vadd.f32 %v958_v40, %v3790_v36  ;;  %v35_v16 = vld [vmem:[%s4375_s0 + $0x48] sm:$0xff] }
 0x464   :  { %1176 = vrot.lane.b32.xlu1 %v1169_v33, %s3497_s27  ;;  %v1171_v37 = vsel %vm811_vm8, %v1168_v30, %v1170_v31  ;;  %v960_v43 = vpop.permute.xlu1 %959  ;;  %2988 = vmatmul.mubr.msk.f32.gmra.mrb[18].mxu0 %vm54_vm6, %v35_v16 }
 0x465   :  { %1178 = vrot.lane.b32.xlu0 %v1171_v37, %s3497_s27  ;;  %v1172_v11 = vrot.slane %v1162_v34, 2  ;;  %3339 = vpow2.f32 %v2764_v41  ;;  %v972_v45 = vadd.f32 %v960_v43, %v3802_v50  ;;  %v2765_v21 = vmul.f32 -1.442695, %v971_v17  ;;  %2990 = vmatprep.mubr.msk.f32.mxu0 %vm3493_vm5, %v3494_v7 }
 0x467   :  { %v1173_v38 = vsel %vm811_vm8, %v1170_v31, %v1172_v11  ;;  %v2766_v51 = vmul.f32 -1.442695, %v972_v45  ;;  %3341 = vpow2.f32 %v2765_v21  ;;  %v37_v31 = vld [vmem:[%s4375_s0 + $0x58] sm:$0xff] }
 0x468   :  { %1180 = vrot.lane.b32.xlu1 %v1173_v38, %s3497_s27  ;;  %v964_v48 = vpop.permute.xlu1 %963  ;;  %2991 = vmatmul.mubr.msk.f32.gmra.mrb[20].mxu0 %vm54_vm6, %v36_v29 }
 0x469   :  { %1182 = vrot.lane.b32.xlu0 %v1172_v11, %s3497_s27  ;;  %v974_v27 = vadd.f32 %v964_v48, %v3796_v44  ;;  %3343 = vpow2.f32 %v2766_v51  ;;  %2993 = vmatprep.mubr.msk.f32.mxu0 %vm3493_vm5, %v3494_v7 }
 0x46a   :  { %3345 = vpow2.f32 %v2767_v35 }
 0x46b   :  { %v2768_v42 = vmul.f32 -1.442695, %v974_v27 }
 0x46c   :  { %2994 = vmatmul.mubr.msk.f32.gmra.mrb[22].mxu0 %vm54_vm6, %v37_v31 }
 0x46d   :  { %3347 = vpow2.f32 %v2768_v42  ;;  %2996 = vmatprep.mubr.msk.f32.mxu0 %vm3493_vm5, %v3494_v7 }
 0x46f   :  { %v3340_v52 = vpop.eup %3339 }
 0x470   :  { %v990_v53 = vadd.f32 1.0, %v3340_v52 }
 0x471   :  { %v3342_v36 = vpop.eup %3341 }
 0x472   :  { %3349 = vrcp.f32 %v990_v53  ;;  %v991_v50 = vadd.f32 1.0, %v3342_v36 }
 0x473   :  { %v3344_v54 = vpop.eup %3343 }
 0x474   :  { %v3346_v55 = vpop.eup %3345  ;;  %v992_v56 = vadd.f32 1.0, %v3344_v54  ;;  %3351 = vrcp.f32 %v991_v50 }
 0x475   :  { %v993_v47 = vadd.f32 1.0, %v3346_v55 }
 0x476   :  { %3353 = vrcp.f32 %v992_v56 }
 0x477   :  { %v3348_v58 = vpop.eup %3347  ;;  %3355 = vrcp.f32 %v993_v47 }
 0x478   :  { %v994_v60 = vadd.f32 1.0, %v3348_v58 }
 0x47a   :  { %3357 = vrcp.f32 %v994_v60 }
 0x47c   :  { %v3350_v61 = vpop.eup %3349 }
 0x47e   :  { %v3352_v63 = vpop.eup %3351 }
 0x480   :  { %v3354_v5 = vpop.eup %3353 }
 0x481   :  { %v3356_v22 = vpop.eup %3355 }
 0x484   :  { %v3358_v24 = vpop.eup %3357 }
 0x4ce   :  { %v1175_v62 = vpop.permute.xlu0 %1174 }
 0x4cf   :  { %v1189_v59 = vmul.f32 %v3350_v61, %v1175_v62 }
 0x4d1   :  { %1199 = vrot.lane.b32.xlu1 %v1189_v59, %s3496_s26 }
 0x4d6   :  { %v1177_v1 = vpop.permute.xlu1 %1176 }
 0x4d7   :  { %v1190_v6 = vmul.f32 %v3352_v63, %v1177_v1  ;;  %v1179_v10 = vpop.permute.xlu0 %1178 }
 0x4d8   :  { %v1191_v13 = vmul.f32 %v3354_v5, %v1179_v10 }
 0x4d9   :  { %1201 = vrot.lane.b32.xlu0 %v1190_v6, %s3496_s26 }
 0x4da   :  { %1203 = vrot.lane.b32.xlu1 %v1191_v13, %s3496_s26  ;;  %v1181_v23 = vpop.permute.xlu1 %1180 }
 0x4db   :  { %v1192_v26 = vmul.f32 %v3356_v22, %v1181_v23  ;;  %v1183_v28 = vpop.permute.xlu0 %1182 }
 0x4dc   :  { %v1193_v9 = vmul.f32 %v3358_v24, %v1183_v28 }
 0x4dd   :  { %1205 = vrot.lane.b32.xlu0 %v1192_v26, %s3496_s26 }
 0x4de   :  { %1207 = vrot.lane.b32.xlu1 %v1193_v9, %s3496_s26 }
 0x543   :  { %v1200_v30 = vpop.permute.xlu1 %1199 }
 0x544   :  { %v3898_v32 = vadd.f32 %v3833_v2, %v1200_v30 }
 0x546   :  { %v1224_v38 = vrot.slane %v3898_v32, 6 }
 0x54b   :  { %v1202_v33 = vpop.permute.xlu0 %1201 }
 0x54c   :  { %v1204_v34 = vpop.permute.xlu1 %1203  ;;  %v3903_v37 = vadd.f32 %v3836_v3, %v1202_v33 }
 0x54d   :  { %v3906_v11 = vadd.f32 %v3842_v18, %v1204_v34 }
 0x54e   :  { %v1225_v14 = vrot.slane %v3903_v37, 6 }
 0x54f   :  { %v1227_v39 = vrot.slane %v3906_v11, 6  ;;  %v1206_v40 = vpop.permute.xlu0 %1205 }
 0x550   :  { %v1208_v2 = vpop.permute.xlu1 %1207  ;;  %v3912_v41 = vadd.f32 %v3844_v20, %v1206_v40  ;;  %v1226_v43 = vsel %vm112_vm0, %v1224_v38, %v1225_v14 }
 0x551   :  { %v3916_v17 = vadd.f32 %v3850_v25, %v1208_v2  ;;  %v1228_v3 = vsel %vm112_vm0, %v1225_v14, %v1227_v39  ;;  %1233 = vrot.lane.b32.xlu0 %v1226_v43, %s3498_s3  ;;  %v222_v25 = vpop.f32.mrb[16].mxu0 }
 0x552   :  { %v1229_v18 = vrot.slane %v3912_v41, 6  ;;  %1235 = vrot.lane.b32.xlu1 %v1228_v3, %s3498_s3  ;;  %v2986_v48 = vpop.f32.mrb[17].mxu0  ;;  %v3958_v47 = vadd.f32 %v3652_v19, %v222_v25 }
 0x553   :  { %v1231_v45 = vrot.slane %v3916_v17, 6  ;;  %v227_v21 = vpop.f32.mrb[18].mxu0 }
 0x554   :  { %v1230_v46 = vsel %vm112_vm0, %v1227_v39, %v1229_v18  ;;  %v2989_v49 = vpop.f32.mrb[19].mxu0  ;;  %v3970_v13 = vadd.f32 %v3652_v19, %v227_v21 }
 0x555   :  { %v1232_v20 = vsel %vm112_vm0, %v1229_v18, %v1231_v45  ;;  %1237 = vrot.lane.b32.xlu0 %v1230_v46, %s3498_s3  ;;  %v232_v52 = vpop.f32.mrb[20].mxu0 }
 0x556   :  { %1239 = vrot.lane.b32.xlu1 %v1232_v20, %s3498_s3  ;;  %v2992_v53 = vpop.f32.mrb[21].mxu0  ;;  %v3967_v1 = vadd.f32 %v3652_v19, %v232_v52 }
 0x557   :  { %v237_v36 = vpop.f32.mrb[22].mxu0 }
 0x558   :  { %v2995_v54 = vpop.f32.mrb[23].mxu0  ;;  %v3961_v60 = vadd.f32 %v3652_v19, %v237_v36 }
 0x5c3   :  { %v1234_v51 = vpop.permute.xlu0 %1233 }
 0x5c4   :  { %v1236_v27 = vpop.permute.xlu1 %1235  ;;  %3081 = vmatprep.mubr.msk.f32.mxu1 %vm283_vm7, %v1234_v51 }
 0x5c5   :  { %3082 = vmatmul.mubr.msk.f32.vlgmr.msra.gmra.mrb[24].mxu1 %vm283_vm7, %v1236_v27 }
 0x5c6   :  { %3218 = vmatpush3.bf16.msk.msra.mxu1 %vm3547_vm4, %v3574_v12 }
 0x5c7   :  { %v1238_v35 = vpop.permute.xlu0 %1237  ;;  %3221 = vmatprep.subr.msk.bf16.mxu1 %vm3547_vm4, %v3589_v15 }
 0x5c8   :  { %v1240_v42 = vpop.permute.xlu1 %1239  ;;  %3084 = vmatprep.mubr.msk.f32.mxu1 %vm283_vm7, %v1238_v35 }
 0x5c9   :  { %3085 = vmatmul.mubr.msk.f32.gmra.mrb[26].mxu1 %vm283_vm7, %v1240_v42 }
 0x5ca   :  { %3091 = vmatprep.mubr.msk.f32.mxu1 %vm283_vm7, %v1234_v51 }
 0x5cd   :  { %3092 = vmatmul.mubr.msk.f32.vlgmr.msra.gmra.mrb[28].mxu1 %vm283_vm7, %v1236_v27 }
 0x5ce   :  { %3094 = vmatprep.mubr.msk.f32.mxu1 %vm283_vm7, %v1238_v35  ;;  %3224 = vmatpush3.bf16.msk.msra.mxu1 %vm3547_vm4, %v3589_v15 }
 0x5cf   :  { %3227 = vmatprep.subr.msk.bf16.mxu1 %vm3547_vm4, %v3560_v8 }
 0x5d1   :  { %3095 = vmatmul.mubr.msk.f32.gmra.mrb[30].mxu1 %vm283_vm7, %v1240_v42 }
 0x5d2   :  { %3101 = vmatprep.mubr.msk.f32.mxu1 %vm283_vm7, %v1234_v51 }
 0x5d5   :  { %3102 = vmatmul.mubr.msk.f32.vlgmr.msra.gmra.mrb[32].mxu1 %vm283_vm7, %v1236_v27 }
 0x5d6   :  { %3104 = vmatprep.mubr.msk.f32.mxu1 %vm283_vm7, %v1238_v35  ;;  %3230 = vmatpush3.bf16.msk.msra.mxu1 %vm3547_vm4, %v3560_v8 }
 0x5d7   :  { %3239 = vmatprep.subr.msk.bf16.mxu1 %vm3547_vm4, %v3589_v15 }
 0x5d9   :  { %3105 = vmatmul.mubr.msk.f32.gmra.mrb[34].mxu1 %vm283_vm7, %v1240_v42 }
 0x698   :  { %v3083_v50 = vpop.f32.mrb[24].mxu1 }
 0x699   :  { %v1339_v55 = vrot.slane %v3083_v50, 4  ;;  %v1315_v56 = vpop.f32.mrb[25].mxu1 }
 0x69a   :  { %v1338_v58 = vrot.slane %v1315_v56, 4 }
 0x69c   :  { %v1340_v61 = vsel %vm287_vm1, %v1338_v58, %v1339_v55  ;;  %v1350_v62 = vadd.f32 %v1338_v58, %v3796_v44  ;;  %v3086_v59 = vpop.f32.mrb[26].mxu1 }
 0x69d   :  { %v1351_v63 = vadd.f32 %v1340_v61, %v3958_v47  ;;  %v1343_v0 = vrot.slane %v3086_v59, 4  ;;  %v1325_v5 = vpop.f32.mrb[27].mxu1 }
 0x69e   :  { %v2779_v6 = vmul.f32 -1.442695, %v1350_v62  ;;  %v1341_v10 = vrot.slane %v1325_v5, 4 }
 0x69f   :  { %v2780_v16 = vmul.f32 -1.442695, %v1351_v63  ;;  %v1354_v22 = vadd.f32 %v1343_v0, %v3961_v60 }
 0x6a0   :  { %3359 = vpow2.f32 %v2779_v6  ;;  %v1342_v23 = vsel %vm287_vm1, %v1339_v55, %v1341_v10  ;;  %v1344_v24 = vsel %vm287_vm1, %v1341_v10, %v1343_v0  ;;  %v3093_v26 = vpop.f32.mrb[28].mxu1 }
 0x6a1   :  { %3361 = vpow2.f32 %v2780_v16  ;;  %v2783_v28 = vmul.f32 -1.442695, %v1354_v22  ;;  %v1352_v9 = vadd.f32 %v1342_v23, %v3970_v13  ;;  %v1353_v29 = vadd.f32 %v1344_v24, %v3967_v1  ;;  %v1451_v30 = vpop.f32.mrb[29].mxu1 }
 0x6a2   :  { %v1475_v31 = vrot.slane %v3093_v26, 4  ;;  %v1474_v33 = vrot.slane %v1451_v30, 4 }
 0x6a3   :  { %3363 = vpow2.f32 %v2783_v28  ;;  %v2781_v19 = vmul.f32 -1.442695, %v1352_v9  ;;  %v2782_v34 = vmul.f32 -1.442695, %v1353_v29 }
 0x6a4   :  { %v3096_v38 = vpop.f32.mrb[30].mxu1  ;;  %v1476_v14 = vsel %vm287_vm1, %v1474_v33, %v1475_v31 }
 0x6a5   :  { %3365 = vpow2.f32 %v2781_v19  ;;  %v1479_v39 = vrot.slane %v3096_v38, 4  ;;  %v1461_v40 = vpop.f32.mrb[31].mxu1 }
 0x6a6   :  { %3367 = vpow2.f32 %v2782_v34  ;;  %v1477_v2 = vrot.slane %v1461_v40, 4 }
 0x6a8   :  { %v3103_v43 = vpop.f32.mrb[32].mxu1  ;;  %v1478_v3 = vsel %vm287_vm1, %v1475_v31, %v1477_v2  ;;  %v1480_v18 = vsel %vm287_vm1, %v1477_v2, %v1479_v39 }
 0x6a9   :  { %v1603_v45 = vadd.f32 %v3103_v43, %v3673_v57  ;;  %v1597_v46 = vpop.f32.mrb[33].mxu1 }
 0x6aa   :  { %v3360_v20 = vpop.eup %3359  ;;  %v1598_v25 = vadd.f32 %v3673_v57, %v1597_v46 }
 0x6ab   :  { %v3362_v48 = vpop.eup %3361  ;;  %v1370_v21 = vadd.f32 1.0, %v3360_v20  ;;  %v1621_v49 = vrot.slane %v1603_v45, 4 }
 0x6ac   :  { %v1371_v51 = vadd.f32 1.0, %v3362_v48  ;;  %v1620_v27 = vrot.slane %v1598_v25, 4  ;;  %v3106_v35 = vpop.f32.mrb[34].mxu1 }
 0x6ad   :  { %v3364_v42 = vpop.eup %3363  ;;  %3369 = vrcp.f32 %v1370_v21  ;;  %v1613_v52 = vadd.f32 %v3106_v35, %v3673_v57  ;;  %v1607_v53 = vpop.f32.mrb[35].mxu1 }
 0x6ae   :  { %3371 = vrcp.f32 %v1371_v51  ;;  %v1374_v36 = vadd.f32 1.0, %v3364_v42  ;;  %v1608_v54 = vadd.f32 %v3673_v57, %v1607_v53  ;;  %v1622_v50 = vsel %vm287_vm1, %v1620_v27, %v1621_v49 }
 0x6af   :  { %v3366_v55 = vpop.eup %3365  ;;  %v1625_v56 = vrot.slane %v1613_v52, 4 }
 0x6b0   :  { %v3368_v58 = vpop.eup %3367  ;;  %3373 = vrcp.f32 %v1374_v36  ;;  %v1372_v61 = vadd.f32 1.0, %v3366_v55  ;;  %v1623_v62 = vrot.slane %v1608_v54, 4 }
 0x6b1   :  { %v1373_v59 = vadd.f32 1.0, %v3368_v58 }
 0x6b2   :  { %3375 = vrcp.f32 %v1372_v61  ;;  %v1624_v63 = vsel %vm287_vm1, %v1621_v49, %v1623_v62  ;;  %v1626_v0 = vsel %vm287_vm1, %v1623_v62, %v1625_v56 }
 0x6b3   :  { %3377 = vrcp.f32 %v1373_v59 }
 0x6b7   :  { %v3370_v5 = vpop.eup %3369 }
 0x6b8   :  { %v3372_v6 = vpop.eup %3371  ;;  %v1632_v10 = vmul.f32 %v3370_v5, %v1620_v27 }
 0x6b9   :  { %v1633_v16 = vmul.f32 %v3372_v6, %v1622_v50 }
 0x6ba   :  { %v3374_v57 = vpop.eup %3373  ;;  %1642 = vrot.lane.b32.xlu0 %v1632_v10, %s3495_s25 }
 0x6bb   :  { %v1636_v22 = vmul.f32 %v3374_v57, %v1625_v56  ;;  %1644 = vrot.lane.b32.xlu1 %v1633_v16, %s3495_s25 }
 0x6bc   :  { %v3376_v23 = vpop.eup %3375 }
 0x6bd   :  { %v3378_v24 = vpop.eup %3377  ;;  %v1634_v26 = vmul.f32 %v3376_v23, %v1624_v63 }
 0x6be   :  { %v1635_v28 = vmul.f32 %v3378_v24, %v1626_v0 }
 0x6bf   :  { %1646 = vrot.lane.b32.xlu0 %v1634_v26, %s3495_s25 }
 0x6c0   :  { %1648 = vrot.lane.b32.xlu1 %v1635_v28, %s3495_s25 }
 0x6c3   :  { %1650 = vrot.lane.b32.xlu0 %v1636_v22, %s3495_s25 }
 0x6c4   :  { %1481 = vrot.lane.b32.xlu1 %v1474_v33, %s3496_s26 }
 0x6c7   :  { %1483 = vrot.lane.b32.xlu0 %v1476_v14, %s3496_s26 }
 0x6c8   :  { %1485 = vrot.lane.b32.xlu1 %v1478_v3, %s3496_s26 }
 0x6cb   :  { %1487 = vrot.lane.b32.xlu0 %v1480_v18, %s3496_s26 }
 0x6cc   :  { %1489 = vrot.lane.b32.xlu1 %v1479_v39, %s3496_s26 }
 0x72c   :  { %v1643_v9 = vpop.permute.xlu0 %1642 }
 0x72d   :  { %v1657_v29 = vadd.f32 %v1643_v9, %v3796_v44  ;;  %v1645_v30 = vpop.permute.xlu1 %1644 }
 0x72e   :  { %v1658_v31 = vadd.f32 %v1645_v30, %v3958_v47 }
 0x72f   :  { %3379 = vtanh.f32 %v1657_v29 }
 0x730   :  { %3381 = vtanh.f32 %v1658_v31 }
 0x731   :  { %v1647_v19 = vpop.permute.xlu0 %1646 }
 0x732   :  { %v1659_v34 = vadd.f32 %v1647_v19, %v3970_v13  ;;  %v1649_v33 = vpop.permute.xlu1 %1648 }
 0x733   :  { %v1660_v38 = vadd.f32 %v1649_v33, %v3967_v1 }
 0x734   :  { %3383 = vtanh.f32 %v1659_v34 }
 0x735   :  { %3385 = vtanh.f32 %v1660_v38  ;;  %v1651_v14 = vpop.permute.xlu0 %1650 }
 0x736   :  { %v1661_v40 = vadd.f32 %v1651_v14, %v3961_v60 }
 0x738   :  { %3387 = vtanh.f32 %v1661_v40 }
 0x739   :  { %v4002_v39 = vpop.eup %3379  ;;  %v1484_v62 = vpop.permute.xlu0 %1483 }
 0x73a   :  { %v4004_v2 = vpop.eup %3381  ;;  %v1672_v43 = vrot.slane %v4002_v39, 6 }
 0x73b   :  { %v1673_v3 = vrot.slane %v4004_v2, 6 }
 0x73c   :  { %v1686_v18 = vsub.f32 %v3898_v32, %v1672_v43 }
 0x73d   :  { %v1674_v45 = vsel %vm112_vm0, %v1672_v43, %v1673_v3  ;;  %v1488_v6 = vpop.permute.xlu0 %1487  ;;  %v38_v43 = vld [vmem:[%s4375_s0 + $0x60] sm:$0xff] }
 0x73e   :  { %v4010_v46 = vpop.eup %3383  ;;  %v1687_v20 = vsub.f32 %v3903_v37, %v1674_v45  ;;  %v1696_v49 = vrot.slane %v1686_v18, 2  ;;  %v1499_v57 = vadd.f32 %v1488_v6, %v3967_v1  ;;  %2997 = vmatmul.mubr.msk.f32.gmra.mrb[24].mxu0 %vm54_vm6, %v38_v43 }
 0x73f   :  { %v4013_v25 = vpop.eup %3385  ;;  %v1675_v48 = vrot.slane %v4010_v46, 6  ;;  %2999 = vmatprep.mubr.msk.f32.mxu0 %vm3493_vm5, %v3494_v7 }
 0x740   :  { %v1677_v21 = vrot.slane %v4013_v25, 6  ;;  %v1697_v51 = vrot.slane %v1687_v20, 2  ;;  %v2792_v24 = vmul.f32 -1.442695, %v1499_v57 }
 0x741   :  { %v1676_v27 = vsel %vm112_vm0, %v1673_v3, %v1675_v48 }
 0x742   :  { %v4018_v35 = vpop.eup %3387  ;;  %v1698_v32 = vsel %vm811_vm8, %v1696_v49, %v1697_v51  ;;  %v1688_v42 = vsub.f32 %v3906_v11, %v1676_v27  ;;  %v1678_v52 = vsel %vm112_vm0, %v1675_v48, %v1677_v21  ;;  %v39_v48 = vld [vmem:[%s4375_s0 + $0x68] sm:$0xff] }
 0x743   :  { %1705 = vrot.lane.b32.xlu0 %v1698_v32, %s3497_s27  ;;  %v1689_v37 = vsub.f32 %v3912_v41, %v1678_v52  ;;  %v1679_v53 = vrot.slane %v4018_v35, 6  ;;  %v1482_v41 = vpop.permute.xlu1 %1481  ;;  %3000 = vmatmul.mubr.msk.f32.gmra.mrb[26].mxu0 %vm54_vm6, %v39_v48  ;;  %v40_v52 = vld [vmem:[%s4375_s0 + $0x70] sm:$0xff] }
 0x744   :  { %v1699_v36 = vrot.slane %v1688_v42, 2  ;;  %v1496_v59 = vadd.f32 %v1482_v41, %v3796_v44  ;;  %3002 = vmatprep.mubr.msk.f32.mxu0 %vm3493_vm5, %v3494_v7 }
 0x745   :  { %v1701_v54 = vrot.slane %v1689_v37, 2  ;;  %v1680_v50 = vsel %vm112_vm0, %v1677_v21, %v1679_v53  ;;  %v41_v37 = vld [vmem:[%s4375_s0 + $0x78] sm:$0xff]  ;;  %v42_v53 = vld [vmem:[%s4375_s0 + $0x80] sm:$0xff] }
 0x746   :  { %v1700_v55 = vsel %vm811_vm8, %v1697_v51, %v1699_v36  ;;  %v1690_v56 = vsub.f32 %v3916_v17, %v1680_v50  ;;  %v2789_v0 = vmul.f32 -1.442695, %v1496_v59  ;;  %v1497_v17 = vadd.f32 %v1484_v62, %v3958_v47 }
 0x747   :  { %1707 = vrot.lane.b32.xlu1 %v1700_v55, %s3497_s27  ;;  %v1702_v11 = vsel %vm811_vm8, %v1699_v36, %v1701_v54  ;;  %v1486_v63 = vpop.permute.xlu1 %1485  ;;  %3003 = vmatmul.mubr.msk.f32.gmra.mrb[28].mxu0 %vm54_vm6, %v40_v52  ;;  %v43_v36 = vld [vmem:[%s4375_s0 + $0x88] sm:$0xff] }
 0x748   :  { %1709 = vrot.lane.b32.xlu0 %v1702_v11, %s3497_s27  ;;  %v1703_v58 = vrot.slane %v1690_v56, 2  ;;  %v1498_v5 = vadd.f32 %v1486_v63, %v3970_v13  ;;  %3389 = vpow2.f32 %v2789_v0  ;;  %v2790_v16 = vmul.f32 -1.442695, %v1497_v17  ;;  %3005 = vmatprep.mubr.msk.f32.mxu0 %vm3493_vm5, %v3494_v7 }
 0x74a   :  { %v1704_v61 = vsel %vm811_vm8, %v1701_v54, %v1703_v58  ;;  %v2791_v22 = vmul.f32 -1.442695, %v1498_v5  ;;  %3391 = vpow2.f32 %v2790_v16  ;;  %v44_v54 = vld [vmem:[%s4375_s0 + $0x90] sm:$0x3f] }
 0x74b   :  { %1711 = vrot.lane.b32.xlu1 %v1704_v61, %s3497_s27  ;;  %v1490_v10 = vpop.permute.xlu1 %1489  ;;  %3006 = vmatmul.mubr.msk.f32.gmra.mrb[30].mxu0 %vm54_vm6, %v41_v37 }
 0x74c   :  { %1713 = vrot.lane.b32.xlu0 %v1703_v58, %s3497_s27  ;;  %v1500_v23 = vadd.f32 %v1490_v10, %v3961_v60  ;;  %3393 = vpow2.f32 %v2791_v22  ;;  %3008 = vmatprep.mubr.msk.f32.mxu0 %vm3493_vm5, %v3494_v7 }
 0x74d   :  { %3395 = vpow2.f32 %v2792_v24 }
 0x74e   :  { %v2793_v26 = vmul.f32 -1.442695, %v1500_v23 }
 0x74f   :  { %3009 = vmatmul.mubr.msk.f32.gmra.mrb[32].mxu0 %vm54_vm6, %v42_v53 }
 0x750   :  { %3397 = vpow2.f32 %v2793_v26  ;;  %3011 = vmatprep.mubr.msk.f32.mxu0 %vm3493_vm5, %v3494_v7 }
 0x752   :  { %v3390_v44 = vpop.eup %3389 }
 0x753   :  { %v1516_v28 = vadd.f32 1.0, %v3390_v44  ;;  %3012 = vmatmul.mubr.msk.f32.gmra.mrb[34].mxu0 %vm54_vm6, %v43_v36 }
 0x754   :  { %v3392_v47 = vpop.eup %3391  ;;  %3014 = vmatprep.mubr.msk.f32.mxu0 %vm3493_vm5, %v3494_v7 }
 0x755   :  { %3399 = vrcp.f32 %v1516_v28  ;;  %v1517_v13 = vadd.f32 1.0, %v3392_v47 }
 0x756   :  { %v3394_v9 = vpop.eup %3393 }
 0x757   :  { %v3396_v29 = vpop.eup %3395  ;;  %v1518_v30 = vadd.f32 1.0, %v3394_v9  ;;  %3401 = vrcp.f32 %v1517_v13  ;;  %3015 = vmatmul.mubr.msk.f32.gmra.mrb[36].mxu0 %vm54_vm6, %v44_v54 }
 0x758   :  { %v1519_v1 = vadd.f32 1.0, %v3396_v29 }
 0x759   :  { %3403 = vrcp.f32 %v1518_v30 }
 0x75a   :  { %v3398_v31 = vpop.eup %3397  ;;  %3405 = vrcp.f32 %v1519_v1 }
 0x75b   :  { %v1520_v19 = vadd.f32 1.0, %v3398_v31 }
 0x75d   :  { %3407 = vrcp.f32 %v1520_v19 }
 0x75f   :  { %v3400_v34 = vpop.eup %3399 }
 0x761   :  { %v3402_v14 = vpop.eup %3401 }
 0x763   :  { %v3404_v3 = vpop.eup %3403 }
 0x764   :  { %v3406_v21 = vpop.eup %3405 }
 0x767   :  { %v3408_v51 = vpop.eup %3407 }
 0x7b5   :  { %v1706_v33 = vpop.permute.xlu0 %1705 }
 0x7b6   :  { %v1720_v38 = vmul.f32 %v3400_v34, %v1706_v33 }
 0x7b8   :  { %1730 = vrot.lane.b32.xlu1 %v1720_v38, %s3496_s26 }
 0x7b9   :  { %v1708_v40 = vpop.permute.xlu1 %1707 }
 0x7ba   :  { %v1721_v18 = vmul.f32 %v3402_v14, %v1708_v40  ;;  %v1710_v45 = vpop.permute.xlu0 %1709 }
 0x7bb   :  { %v1722_v20 = vmul.f32 %v3404_v3, %v1710_v45 }
 0x7bc   :  { %1732 = vrot.lane.b32.xlu0 %v1721_v18, %s3496_s26  ;;  %v4154_v18 = vld [vmem:[%s4378_s2] ss:$0 sm:$0xff] }
 0x7bd   :  { %1734 = vrot.lane.b32.xlu1 %v1722_v20, %s3496_s26  ;;  %v1712_v49 = vpop.permute.xlu1 %1711 }
 0x7be   :  { %v1723_v27 = vmul.f32 %v3406_v21, %v1712_v49  ;;  %v1714_v32 = vpop.permute.xlu0 %1713 }
 0x7bf   :  { %v1724_v42 = vmul.f32 %v3408_v51, %v1714_v32 }
 0x7c0   :  { %1736 = vrot.lane.b32.xlu0 %v1723_v27, %s3496_s26 }
 0x7c1   :  { %1738 = vrot.lane.b32.xlu1 %v1724_v42, %s3496_s26 }
 0x82a   :  { %v1731_v50 = vpop.permute.xlu1 %1730 }
 0x82b   :  { %v4086_v55 = vadd.f32 %v4002_v39, %v1731_v50 }
 0x82d   :  { %v1755_v7 = vrot.slane %v4086_v55, 4 }
 0x82e   :  { %v1733_v56 = vpop.permute.xlu0 %1732 }
 0x82f   :  { %v1735_v11 = vpop.permute.xlu1 %1734  ;;  %v4089_v58 = vadd.f32 %v4004_v2, %v1733_v56 }
 0x830   :  { %v4092_v61 = vadd.f32 %v4010_v46, %v1735_v11 }
 0x831   :  { %v1756_v41 = vrot.slane %v4089_v58, 4 }
 0x832   :  { %v1758_v62 = vrot.slane %v4092_v61, 4  ;;  %v1737_v59 = vpop.permute.xlu0 %1736 }
 0x833   :  { %v1739_v63 = vpop.permute.xlu1 %1738  ;;  %v4098_v0 = vadd.f32 %v4013_v25, %v1737_v59  ;;  %v1757_v39 = vsel %vm287_vm1, %v1755_v7, %v1756_v41 }
 0x834   :  { %v4102_v17 = vadd.f32 %v4018_v35, %v1739_v63  ;;  %v1759_v2 = vsel %vm287_vm1, %v1756_v41, %v1758_v62  ;;  %1764 = vrot.lane.b32.xlu0 %v1757_v39, %s3498_s3  ;;  %v242_v35 = vpop.f32.mrb[24].mxu0  ;;  %v4181_v39 = vld [vmem:[%s4379_s6] ss:$0 sm:$0xff] }
 0x835   :  { %v1760_v46 = vrot.slane %v4098_v0, 4  ;;  %1766 = vrot.lane.b32.xlu1 %v1759_v2, %s3498_s3  ;;  %v2998_v10 = vpop.f32.mrb[25].mxu0  ;;  %v4157_v45 = vadd.f32 %v4154_v18, %v242_v35 }
 0x836   :  { %v1762_v5 = vrot.slane %v4102_v17, 4  ;;  %v247_v16 = vpop.f32.mrb[26].mxu0 }
 0x837   :  { %v1761_v6 = vsel %vm287_vm1, %v1758_v62, %v1760_v46  ;;  %v3001_v57 = vpop.f32.mrb[27].mxu0  ;;  %v4171_v50 = vadd.f32 %v4154_v18, %v247_v16 }
 0x838   :  { %v1763_v25 = vsel %vm287_vm1, %v1760_v46, %v1762_v5  ;;  %1768 = vrot.lane.b32.xlu0 %v1761_v6, %s3498_s3  ;;  %v252_v22 = vpop.f32.mrb[28].mxu0 }
 0x839   :  { %1770 = vrot.lane.b32.xlu1 %v1763_v25, %s3498_s3  ;;  %v3004_v23 = vpop.f32.mrb[29].mxu0  ;;  %v4167_v51 = vadd.f32 %v4154_v18, %v252_v22 }
 0x83a   :  { %v4113_v24 = vpop.f32.mrb[30].mxu0 }
 0x83b   :  { %v3007_v26 = vpop.f32.mrb[31].mxu0 }
 0x83c   :  { %v4115_v44 = vpop.f32.mrb[32].mxu0 }
 0x83d   :  { %v3010_v28 = vpop.f32.mrb[33].mxu0  ;;  %v4282_v4 = vadd.f32 %v4154_v18, %v4115_v44 }
 0x83e   :  { %v4117_v47 = vpop.f32.mrb[34].mxu0 }
 0x83f   :  { %v3013_v9 = vpop.f32.mrb[35].mxu0  ;;  %v4296_v44 = vadd.f32 %v4154_v18, %v4117_v47 }
 0x840   :  { %v4119_v13 = vpop.f32.mrb[36].mxu0 }
 0x841   :  { %v3016_v30 = vpop.f32.mrb[37].mxu0 }
 0x8a6   :  { %v1765_v29 = vpop.permute.xlu0 %1764 }
 0x8a7   :  { %v1767_v31 = vpop.permute.xlu1 %1766  ;;  %3111 = vmatprep.mubr.msk.f32.mxu1 %vm283_vm7, %v1765_v29  ;;  %3121 = vmatprep.mubr.msk.f32.mxu0 %vm283_vm7, %v1765_v29 }
 0x8a8   :  { %3112 = vmatmul.mubr.msk.f32.vlgmr.msra.gmra.mrb[36].mxu1 %vm283_vm7, %v1767_v31  ;;  %3122 = vmatmul.mubr.msk.f32.vlgmr.msra.gmra.mrb[38].mxu0 %vm283_vm7, %v1767_v31 }
 0x8a9   :  { %3242 = vmatpush3.bf16.msk.msra.mxu1 %vm3547_vm4, %v3589_v15  ;;  %3248 = vmatpush3.bf16.msk.msra.mxu0 %vm3547_vm4, %v3560_v8 }
 0x8aa   :  { %v1769_v1 = vpop.permute.xlu0 %1768  ;;  %3251 = vmatprep.subr.msk.bf16.mxu1 %vm3547_vm4, %v3574_v12  ;;  %3257 = vmatprep.subr.msk.bf16.mxu0 %vm3547_vm4, %v3589_v15 }
 0x8ab   :  { %v1771_v19 = vpop.permute.xlu1 %1770  ;;  %3114 = vmatprep.mubr.msk.f32.mxu1 %vm283_vm7, %v1769_v1  ;;  %3124 = vmatprep.mubr.msk.f32.mxu0 %vm283_vm7, %v1769_v1 }
 0x8ac   :  { %3115 = vmatmul.mubr.msk.f32.gmra.mrb[38].mxu1 %vm283_vm7, %v1771_v19  ;;  %3125 = vmatmul.mubr.msk.f32.gmra.mrb[40].mxu0 %vm283_vm7, %v1771_v19 }
 0x8ad   :  { %3131 = vmatprep.mubr.msk.f32.mxu1 %vm283_vm7, %v1765_v29 }
 0x8b0   :  { %3132 = vmatmul.mubr.msk.f32.vlgmr.msra.gmra.mrb[40].mxu1 %vm283_vm7, %v1767_v31 }
 0x8b1   :  { %3134 = vmatprep.mubr.msk.f32.mxu1 %vm283_vm7, %v1769_v1  ;;  %3254 = vmatpush3.bf16.msk.msra.mxu1 %vm3547_vm4, %v3574_v12 }
 0x8b4   :  { %3135 = vmatmul.mubr.msk.f32.gmra.mrb[42].mxu1 %vm283_vm7, %v1771_v19 }
 0x97b   :  { %v3113_v8 = vpop.f32.mrb[36].mxu1  ;;  %v3123_v34 = vpop.f32.mrb[38].mxu0 }
 0x97c   :  { %v1870_v33 = vrot.slane %v3113_v8, 6  ;;  %v1998_v38 = vrot.slane %v3123_v34, 6  ;;  %v1846_v14 = vpop.f32.mrb[37].mxu1  ;;  %v4148_v40 = vpop.f32.mrb[39].mxu0 }
 0x97d   :  { %v1869_v43 = vrot.slane %v1846_v14, 6  ;;  %v1997_v3 = vrot.slane %v4148_v40, 6 }
 0x97f   :  { %v1871_v12 = vsel %vm112_vm0, %v1869_v43, %v1870_v33  ;;  %v1880_v20 = vadd.f32 %v1869_v43, %v3961_v60  ;;  %v3116_v48 = vpop.f32.mrb[38].mxu1  ;;  %v3126_v21 = vpop.f32.mrb[40].mxu0  ;;  %v4164_v49 = vsel %vm112_vm0, %v1997_v3, %v1998_v38 }
 0x980   :  { %v1881_v27 = vadd.f32 %v1871_v12, %v4157_v45  ;;  %v1874_v32 = vrot.slane %v3116_v48, 6  ;;  %v2002_v42 = vrot.slane %v3126_v21, 6  ;;  %v1856_v52 = vpop.f32.mrb[39].mxu1  ;;  %v1984_v37 = vpop.f32.mrb[41].mxu0 }
 0x981   :  { %v2804_v53 = vmul.f32 -1.442695, %v1880_v20  ;;  %v1872_v36 = vrot.slane %v1856_v52, 6  ;;  %v2000_v54 = vrot.slane %v1984_v37, 6 }
 0x982   :  { %v2805_v56 = vmul.f32 -1.442695, %v1881_v27 }
 0x983   :  { %3409 = vpow2.f32 %v2804_v53  ;;  %v1873_v11 = vsel %vm112_vm0, %v1870_v33, %v1872_v36  ;;  %v1875_v7 = vsel %vm112_vm0, %v1872_v36, %v1874_v32  ;;  %v3133_v41 = vpop.f32.mrb[40].mxu1  ;;  %v2003_v62 = vsel %vm112_vm0, %v2000_v54, %v2002_v42 }
 0x984   :  { %3411 = vpow2.f32 %v2805_v56  ;;  %v1882_v59 = vadd.f32 %v1873_v11, %v4171_v50  ;;  %v1883_v63 = vadd.f32 %v1875_v7, %v4167_v51  ;;  %v2116_v2 = vadd.f32 %v4181_v39, %v3133_v41  ;;  %v2110_v46 = vpop.f32.mrb[41].mxu1 }
 0x985   :  { %v2111_v5 = vadd.f32 %v4181_v39, %v2110_v46  ;;  %v2001_v6 = vsel %vm112_vm0, %v1998_v38, %v2000_v54 }
 0x986   :  { %v2806_v25 = vmul.f32 -1.442695, %v1882_v59  ;;  %v2807_v35 = vmul.f32 -1.442695, %v1883_v63  ;;  %v2134_v10 = vrot.slane %v2116_v2, 6 }
 0x987   :  { %v2133_v16 = vrot.slane %v2111_v5, 6  ;;  %v3136_v57 = vpop.f32.mrb[42].mxu1 }
 0x988   :  { %3413 = vpow2.f32 %v2806_v25  ;;  %v2126_v22 = vadd.f32 %v4181_v39, %v3136_v57  ;;  %v2120_v23 = vpop.f32.mrb[43].mxu1 }
 0x989   :  { %3415 = vpow2.f32 %v2807_v35  ;;  %v2121_v26 = vadd.f32 %v4181_v39, %v2120_v23  ;;  %v2135_v28 = vsel %vm112_vm0, %v2133_v16, %v2134_v10 }
 0x98a   :  { %v2138_v9 = vrot.slane %v2126_v22, 6 }
 0x98b   :  { %v2136_v29 = vrot.slane %v2121_v26, 6 }
 0x98d   :  { %v3410_v30 = vpop.eup %3409  ;;  %v2137_v31 = vsel %vm112_vm0, %v2134_v10, %v2136_v29  ;;  %v2139_v1 = vsel %vm112_vm0, %v2136_v29, %v2138_v9 }
 0x98e   :  { %v3412_v19 = vpop.eup %3411  ;;  %v1896_v8 = vadd.f32 1.0, %v3410_v30 }
 0x98f   :  { %v1897_v34 = vadd.f32 1.0, %v3412_v19 }
 0x990   :  { %3417 = vrcp.f32 %v1896_v8 }
 0x991   :  { %3419 = vrcp.f32 %v1897_v34 }
 0x992   :  { %v3414_v33 = vpop.eup %3413 }
 0x993   :  { %v3416_v38 = vpop.eup %3415  ;;  %v1898_v14 = vadd.f32 1.0, %v3414_v33 }
 0x994   :  { %v1899_v43 = vadd.f32 1.0, %v3416_v38 }
 0x995   :  { %3421 = vrcp.f32 %v1898_v14 }
 0x996   :  { %3423 = vrcp.f32 %v1899_v43 }
 0x99a   :  { %v3418_v12 = vpop.eup %3417 }
 0x99b   :  { %v3420_v20 = vpop.eup %3419  ;;  %v2144_v48 = vmul.f32 %v3418_v12, %v2133_v16 }
 0x99c   :  { %v2145_v21 = vmul.f32 %v3420_v20, %v2135_v28 }
 0x99d   :  { %2152 = vrot.lane.b32.xlu0 %v2144_v48, %s3495_s25 }
 0x99e   :  { %2154 = vrot.lane.b32.xlu1 %v2145_v21, %s3495_s25 }
 0x99f   :  { %v3422_v27 = vpop.eup %3421 }
 0x9a0   :  { %v3424_v32 = vpop.eup %3423  ;;  %v2146_v42 = vmul.f32 %v3422_v27, %v2137_v31 }
 0x9a1   :  { %v2147_v52 = vmul.f32 %v3424_v32, %v2139_v1 }
 0x9a2   :  { %2156 = vrot.lane.b32.xlu0 %v2146_v42, %s3495_s25 }
 0x9a3   :  { %2158 = vrot.lane.b32.xlu1 %v2147_v52, %s3495_s25 }
 0x9a6   :  { %2004 = vrot.lane.b32.xlu0 %v1997_v3, %s3496_s26 }
 0x9a7   :  { %2006 = vrot.lane.b32.xlu1 %v4164_v49, %s3496_s26 }
 0x9aa   :  { %2008 = vrot.lane.b32.xlu0 %v2001_v6, %s3496_s26 }
 0x9ab   :  { %2010 = vrot.lane.b32.xlu1 %v2003_v62, %s3496_s26 }
 0xa0f   :  { %v2153_v37 = vpop.permute.xlu0 %2152 }
 0xa10   :  { %v2164_v53 = vadd.f32 %v2153_v37, %v3961_v60  ;;  %v2155_v36 = vpop.permute.xlu1 %2154 }
 0xa11   :  { %v2165_v54 = vadd.f32 %v2155_v36, %v4157_v45 }
 0xa12   :  { %3425 = vtanh.f32 %v2164_v53 }
 0xa13   :  { %3427 = vtanh.f32 %v2165_v54 }
 0xa14   :  { %v2157_v56 = vpop.permute.xlu0 %2156 }
 0xa15   :  { %v2166_v11 = vadd.f32 %v2157_v56, %v4171_v50  ;;  %v2159_v40 = vpop.permute.xlu1 %2158 }
 0xa16   :  { %v2167_v3 = vadd.f32 %v2159_v40, %v4167_v51 }
 0xa17   :  { %3429 = vtanh.f32 %v2166_v11 }
 0xa18   :  { %3431 = vtanh.f32 %v2167_v3 }
 0xa19   :  { %v2007_v31 = vpop.permute.xlu1 %2006 }
 0xa1a   :  { %v2017_v8 = vadd.f32 %v2007_v31, %v4157_v45  ;;  %v4292_v31 = vadd.f32 %v4154_v18, %v4119_v13 }
 0xa1c   :  { %v4206_v49 = vpop.eup %3425  ;;  %v2814_v38 = vmul.f32 -1.442695, %v2017_v8 }
 0xa1d   :  { %v4208_v7 = vpop.eup %3427  ;;  %v2176_v41 = vrot.slane %v4206_v49, 6  ;;  %v2011_v34 = vpop.permute.xlu1 %2010 }
 0xa1e   :  { %v2177_v62 = vrot.slane %v4208_v7, 6  ;;  %v2019_v14 = vadd.f32 %v2011_v34, %v4167_v51 }
 0xa1f   :  { %v2188_v59 = vsub.f32 %v4086_v55, %v2176_v41 }
 0xa20   :  { %v2178_v63 = vsel %vm112_vm0, %v2176_v41, %v2177_v62  ;;  %v2816_v12 = vmul.f32 -1.442695, %v2019_v14 }
 0xa21   :  { %v4214_v2 = vpop.eup %3429  ;;  %v2189_v46 = vsub.f32 %v4089_v58, %v2178_v63  ;;  %v2198_v35 = vrot.slane %v2188_v59, 2 }
 0xa22   :  { %v4217_v5 = vpop.eup %3431  ;;  %v2179_v6 = vrot.slane %v4214_v2, 6 }
 0xa23   :  { %v2181_v25 = vrot.slane %v4217_v5, 6  ;;  %v2199_v10 = vrot.slane %v2189_v46, 2 }
 0xa24   :  { %v2180_v16 = vsel %vm112_vm0, %v2177_v62, %v2179_v6 }
 0xa25   :  { %v2200_v57 = vsel %vm811_vm8, %v2198_v35, %v2199_v10  ;;  %v2190_v55 = vsub.f32 %v4092_v61, %v2180_v16  ;;  %v2182_v22 = vsel %vm112_vm0, %v2179_v6, %v2181_v25  ;;  %v2192_v23 = vsub.f32 %v4102_v17, %v2181_v25  ;;  %v2005_v17 = vpop.permute.xlu0 %2004 }
 0xa26   :  { %2207 = vrot.lane.b32.xlu0 %v2200_v57, %s3497_s27  ;;  %v2191_v58 = vsub.f32 %v4098_v0, %v2182_v22  ;;  %v2016_v1 = vadd.f32 %v2005_v17, %v3961_v60 }
 0xa27   :  { %v2201_v26 = vrot.slane %v2190_v55, 2  ;;  %v2205_v29 = vrot.slane %v2192_v23, 2 }
 0xa28   :  { %v2203_v28 = vrot.slane %v2191_v58, 2  ;;  %v2813_v19 = vmul.f32 -1.442695, %v2016_v1 }
 0xa29   :  { %v2202_v9 = vsel %vm811_vm8, %v2199_v10, %v2201_v26  ;;  %v2009_v0 = vpop.permute.xlu0 %2008 }
 0xa2a   :  { %2209 = vrot.lane.b32.xlu1 %v2202_v9, %s3497_s27  ;;  %v2204_v30 = vsel %vm811_vm8, %v2201_v26, %v2203_v28  ;;  %v2206_v61 = vsel %vm811_vm8, %v2203_v28, %v2205_v29  ;;  %v2018_v33 = vadd.f32 %v2009_v0, %v4171_v50  ;;  %3433 = vpow2.f32 %v2813_v19 }
 0xa2b   :  { %2211 = vrot.lane.b32.xlu0 %v2204_v30, %s3497_s27  ;;  %3435 = vpow2.f32 %v2814_v38 }
 0xa2c   :  { %v2815_v43 = vmul.f32 -1.442695, %v2018_v33 }
 0xa2e   :  { %2213 = vrot.lane.b32.xlu1 %v2206_v61, %s3497_s27  ;;  %3437 = vpow2.f32 %v2815_v43 }
 0xa2f   :  { %3439 = vpow2.f32 %v2816_v12 }
 0xa34   :  { %v3434_v20 = vpop.eup %3433 }
 0xa35   :  { %v2032_v48 = vadd.f32 1.0, %v3434_v20  ;;  %v3436_v21 = vpop.eup %3435 }
 0xa36   :  { %v2033_v27 = vadd.f32 1.0, %v3436_v21 }
 0xa37   :  { %3441 = vrcp.f32 %v2032_v48 }
 0xa38   :  { %v3438_v60 = vpop.eup %3437  ;;  %3443 = vrcp.f32 %v2033_v27 }
 0xa39   :  { %v3440_v32 = vpop.eup %3439  ;;  %v2034_v45 = vadd.f32 1.0, %v3438_v60 }
 0xa3a   :  { %v2035_v42 = vadd.f32 1.0, %v3440_v32 }
 0xa3b   :  { %3445 = vrcp.f32 %v2034_v45 }
 0xa3c   :  { %3447 = vrcp.f32 %v2035_v42 }
 0xa41   :  { %v3442_v50 = vpop.eup %3441 }
 0xa42   :  { %v3444_v37 = vpop.eup %3443 }
 0xa45   :  { %v3446_v36 = vpop.eup %3445 }
 0xa46   :  { %v3448_v40 = vpop.eup %3447 }
 0xa98   :  { %v2208_v52 = vpop.permute.xlu0 %2207 }
 0xa99   :  { %v2219_v51 = vmul.f32 %v3442_v50, %v2208_v52 }
 0xa9b   :  { %2227 = vrot.lane.b32.xlu0 %v2219_v51, %s3496_s26 }
 0xa9c   :  { %v2210_v53 = vpop.permute.xlu1 %2209 }
 0xa9d   :  { %v2220_v54 = vmul.f32 %v3444_v37, %v2210_v53  ;;  %v2212_v56 = vpop.permute.xlu0 %2211 }
 0xa9e   :  { %v2221_v11 = vmul.f32 %v3446_v36, %v2212_v56 }
 0xa9f   :  { %2229 = vrot.lane.b32.xlu1 %v2220_v54, %s3496_s26 }
 0xaa0   :  { %2231 = vrot.lane.b32.xlu0 %v2221_v11, %s3496_s26  ;;  %v2214_v3 = vpop.permute.xlu1 %2213 }
 0xaa1   :  { %v2222_v41 = vmul.f32 %v3448_v40, %v2214_v3 }
 0xaa3   :  { %2233 = vrot.lane.b32.xlu1 %v2222_v41, %s3496_s26 }
 0xb0d   :  { %v2228_v62 = vpop.permute.xlu0 %2227 }
 0xb0e   :  { %v4243_v59 = vadd.f32 %v4206_v49, %v2228_v62 }
 0xb10   :  { %v2247_v35 = vrot.slane %v4243_v59, 2 }
 0xb11   :  { %v2230_v63 = vpop.permute.xlu1 %2229 }
 0xb12   :  { %v4246_v46 = vadd.f32 %v4208_v7, %v2230_v63  ;;  %v2232_v6 = vpop.permute.xlu0 %2231 }
 0xb13   :  { %v4249_v25 = vadd.f32 %v4214_v2, %v2232_v6 }
 0xb14   :  { %v2248_v10 = vrot.slane %v4246_v46, 2 }
 0xb15   :  { %v2250_v16 = vrot.slane %v4249_v25, 2  ;;  %v2234_v57 = vpop.permute.xlu1 %2233 }
 0xb16   :  { %v4255_v55 = vadd.f32 %v4217_v5, %v2234_v57  ;;  %v2249_v49 = vsel %vm811_vm8, %v2247_v35, %v2248_v10 }
 0xb17   :  { %2254 = vrot.lane.b32.xlu0 %v2249_v49, %s3498_s3  ;;  %v2251_v7 = vsel %vm811_vm8, %v2248_v10, %v2250_v16 }
 0xb18   :  { %v2252_v22 = vrot.slane %v4255_v55, 2  ;;  %2256 = vrot.lane.b32.xlu1 %v2251_v7, %s3498_s3 }
 0xb1a   :  { %v2253_v2 = vsel %vm811_vm8, %v2250_v16, %v2252_v22 }
 0xb1b   :  { %2258 = vrot.lane.b32.xlu0 %v2253_v2, %s3498_s3 }
 0xb1c   :  { %2260 = vrot.lane.b32.xlu1 %v2252_v22, %s3498_s3 }
 0xb89   :  { %v2255_v23 = vpop.permute.xlu0 %2254 }
 0xb8a   :  { %v2257_v58 = vpop.permute.xlu1 %2256  ;;  %3141 = vmatprep.mubr.msk.f32.mxu0 %vm283_vm7, %v2255_v23  ;;  %3151 = vmatprep.mubr.msk.f32.mxu1 %vm283_vm7, %v2255_v23 }
 0xb8b   :  { %3142 = vmatmul.mubr.msk.f32.vlgmr.msra.gmra.mrb[42].mxu0 %vm283_vm7, %v2257_v58  ;;  %3152 = vmatmul.mubr.msk.f32.vlgmr.msra.gmra.mrb[44].mxu1 %vm283_vm7, %v2257_v58 }
 0xb8c   :  { %3260 = vmatpush3.bf16.msk.msra.mxu0 %vm3547_vm4, %v3589_v15  ;;  %v4286_v15 = vadd.f32 %v4154_v18, %v4113_v24 }
 0xb8d   :  { %v2259_v5 = vpop.permute.xlu0 %2258 }
 0xb8e   :  { %v2261_v26 = vpop.permute.xlu1 %2260  ;;  %3144 = vmatprep.mubr.msk.f32.mxu0 %vm283_vm7, %v2259_v5  ;;  %3154 = vmatprep.mubr.msk.f32.mxu1 %vm283_vm7, %v2259_v5 }
 0xb8f   :  { %3145 = vmatmul.mubr.msk.f32.gmra.mrb[44].mxu0 %vm283_vm7, %v2261_v26  ;;  %3155 = vmatmul.mubr.msk.f32.gmra.mrb[46].mxu1 %vm283_vm7, %v2261_v26 }
 0xb90   :  { %3161 = vmatprep.mubr.msk.f32.mxu0 %vm283_vm7, %v2255_v23 }
 0xb93   :  { %3162 = vmatmul.mubr.msk.f32.vlgmr.msra.gmra.mrb[46].mxu0 %vm283_vm7, %v2257_v58 }
 0xb94   :  { %3164 = vmatprep.mubr.msk.f32.mxu0 %vm283_vm7, %v2259_v5 }
 0xb97   :  { %3165 = vmatmul.mubr.msk.f32.gmra.mrb[48].mxu0 %vm283_vm7, %v2261_v26 }
 0xc5e   :  { %v3143_v28 = vpop.f32.mrb[42].mxu0  ;;  %v3153_v9 = vpop.f32.mrb[44].mxu1 }
 0xc5f   :  { %v2356_v29 = vadd.f32 %v3143_v28, %v4282_v4  ;;  %v2336_v30 = vpop.f32.mrb[43].mxu0  ;;  %v2449_v61 = vpop.f32.mrb[45].mxu1 }
 0xc60   :  { %v2355_v17 = vadd.f32 %v2336_v30, %v4286_v15 }
 0xc61   :  { %v2828_v1 = vmul.f32 -1.442695, %v2356_v29 }
 0xc62   :  { %v2827_v0 = vmul.f32 -1.442695, %v2355_v17  ;;  %v3146_v24 = vpop.f32.mrb[44].mxu0  ;;  %v3156_v19 = vpop.f32.mrb[46].mxu1 }
 0xc63   :  { %3449 = vpow2.f32 %v2828_v1  ;;  %v2358_v8 = vadd.f32 %v3146_v24, %v4292_v31  ;;  %v2346_v34 = vpop.f32.mrb[45].mxu0  ;;  %v2459_v33 = vpop.f32.mrb[47].mxu1 }
 0xc64   :  { %3451 = vpow2.f32 %v2827_v0  ;;  %v2357_v38 = vadd.f32 %v2346_v34, %v4296_v44 }
 0xc65   :  { %v2830_v14 = vmul.f32 -1.442695, %v2358_v8 }
 0xc66   :  { %v2829_v43 = vmul.f32 -1.442695, %v2357_v38  ;;  %v3163_v13 = vpop.f32.mrb[46].mxu0 }
 0xc67   :  { %3453 = vpow2.f32 %v2830_v14  ;;  %v2578_v12 = vpop.f32.mrb[47].mxu0  ;;  %v2584_v50 = vadd.f32 %v4181_v39, %v3163_v13 }
 0xc68   :  { %3455 = vpow2.f32 %v2829_v43  ;;  %v2579_v51 = vadd.f32 %v4181_v39, %v2578_v12 }
 0xc6a   :  { %v3166_v20 = vpop.f32.mrb[48].mxu0 }
 0xc6b   :  { %v2588_v47 = vpop.f32.mrb[49].mxu0  ;;  %v2594_v54 = vadd.f32 %v4181_v39, %v3166_v20 }
 0xc6c   :  { %v2589_v11 = vadd.f32 %v4181_v39, %v2588_v47 }
 0xc6d   :  { %v3450_v18 = vpop.eup %3449 }
 0xc6e   :  { %v3452_v48 = vpop.eup %3451  ;;  %v2372_v21 = vadd.f32 1.0, %v3450_v18 }
 0xc6f   :  { %v2371_v60 = vadd.f32 1.0, %v3452_v48 }
 0xc70   :  { %3457 = vrcp.f32 %v2372_v21 }
 0xc71   :  { %v3454_v27 = vpop.eup %3453  ;;  %3459 = vrcp.f32 %v2371_v60 }
 0xc72   :  { %v3456_v32 = vpop.eup %3455  ;;  %v2374_v45 = vadd.f32 1.0, %v3454_v27 }
 0xc73   :  { %v2373_v42 = vadd.f32 1.0, %v3456_v32 }
 0xc74   :  { %3461 = vrcp.f32 %v2374_v45 }
 0xc75   :  { %3463 = vrcp.f32 %v2373_v42 }
 0xc7a   :  { %v3458_v52 = vpop.eup %3457 }
 0xc7b   :  { %v3460_v37 = vpop.eup %3459  ;;  %v2598_v53 = vmul.f32 %v3458_v52, %v2584_v50 }
 0xc7c   :  { %v2597_v36 = vmul.f32 %v3460_v37, %v2579_v51 }
 0xc7d   :  { %2607 = vrot.lane.b32.xlu1 %v2598_v53, %s3495_s25 }
 0xc7e   :  { %v3462_v56 = vpop.eup %3461  ;;  %2605 = vrot.lane.b32.xlu0 %v2597_v36, %s3495_s25 }
 0xc7f   :  { %v3464_v40 = vpop.eup %3463  ;;  %v2600_v3 = vmul.f32 %v3462_v56, %v2594_v54 }
 0xc80   :  { %v2599_v41 = vmul.f32 %v3464_v40, %v2589_v11 }
 0xc81   :  { %2611 = vrot.lane.b32.xlu1 %v2600_v3, %s3495_s25 }
 0xc82   :  { %2609 = vrot.lane.b32.xlu0 %v2599_v41, %s3495_s25 }
 0xc85   :  { %2474 = vrot.lane.b32.xlu1 %v3153_v9, %s3496_s26 }
 0xc86   :  { %2472 = vrot.lane.b32.xlu0 %v2449_v61, %s3496_s26 }
 0xc89   :  { %2478 = vrot.lane.b32.xlu1 %v3156_v19, %s3496_s26 }
 0xc8a   :  { %2476 = vrot.lane.b32.xlu0 %v2459_v33, %s3496_s26 }
 0xcef   :  { %v2608_v62 = vpop.permute.xlu1 %2607 }
 0xcf0   :  { %v2618_v39 = vadd.f32 %v2608_v62, %v4282_v4  ;;  %v2606_v63 = vpop.permute.xlu0 %2605 }
 0xcf1   :  { %v2617_v6 = vadd.f32 %v2606_v63, %v4286_v15 }
 0xcf2   :  { %3465 = vtanh.f32 %v2618_v39 }
 0xcf3   :  { %3467 = vtanh.f32 %v2617_v6  ;;  %v2612_v35 = vpop.permute.xlu1 %2611 }
 0xcf4   :  { %v2620_v10 = vadd.f32 %v2612_v35, %v4292_v31  ;;  %v2610_v16 = vpop.permute.xlu0 %2609 }
 0xcf5   :  { %v2619_v57 = vadd.f32 %v2610_v16, %v4296_v44 }
 0xcf6   :  { %3469 = vtanh.f32 %v2620_v10 }
 0xcf7   :  { %3471 = vtanh.f32 %v2619_v57  ;;  %v2475_v38 = vpop.permute.xlu1 %2474 }
 0xcf8   :  { %v2473_v33 = vpop.permute.xlu0 %2472 }
 0xcfb   :  { %v2479_v12 = vpop.permute.xlu1 %2478 }
 0xcfc   :  { %v4316_v49 = vpop.eup %3465  ;;  %v2477_v14 = vpop.permute.xlu0 %2476  ;;  %v2487_v47 = vadd.f32 %v2479_v12, %v4292_v31 }
 0xcfd   :  { %v4318_v7 = vpop.eup %3467  ;;  %v2630_v22 = vrot.slane %v4316_v49, 6  ;;  %v2486_v13 = vadd.f32 %v2477_v14, %v4296_v44 }
 0xcfe   :  { %v2629_v2 = vrot.slane %v4318_v7, 6  ;;  %v2839_v48 = vmul.f32 -1.442695, %v2487_v47 }
 0xcff   :  { %v2838_v18 = vmul.f32 -1.442695, %v2486_v13 }
 0xd00   :  { %v4322_v23 = vpop.eup %3469  ;;  %v2631_v58 = vsel %vm112_vm0, %v2629_v2, %v2630_v22  ;;  %v2640_v5 = vsub.f32 %v4243_v59, %v2629_v2 }
 0xd01   :  { %v4326_v26 = vpop.eup %3471  ;;  %v2634_v28 = vrot.slane %v4322_v23, 6  ;;  %v2641_v9 = vsub.f32 %v4246_v46, %v2631_v58 }
 0xd02   :  { %v2632_v29 = vrot.slane %v4326_v26, 6  ;;  %v2648_v30 = vrot.slane %v2640_v5, 2 }
 0xd03   :  { %v2649_v61 = vrot.slane %v2641_v9, 2 }
 0xd04   :  { %v2633_v17 = vsel %vm112_vm0, %v2630_v22, %v2632_v29  ;;  %v2635_v1 = vsel %vm112_vm0, %v2632_v29, %v2634_v28 }
 0xd05   :  { %v2650_v0 = vsel %vm811_vm8, %v2648_v30, %v2649_v61  ;;  %v2642_v24 = vsub.f32 %v4249_v25, %v2633_v17  ;;  %v2643_v59 = vsub.f32 %v4255_v55, %v2635_v1  ;;  %v2484_v25 = vadd.f32 %v2473_v33, %v4286_v15 }
 0xd06   :  { %2655 = vrot.lane.b32.xlu0 %v2650_v0, %s3497_s27  ;;  %v2485_v55 = vadd.f32 %v2475_v38, %v4282_v4 }
 0xd07   :  { %v2651_v19 = vrot.slane %v2642_v24, 2  ;;  %v2653_v8 = vrot.slane %v2643_v59, 2  ;;  %v2836_v43 = vmul.f32 -1.442695, %v2484_v25 }
 0xd08   :  { %v2837_v20 = vmul.f32 -1.442695, %v2485_v55 }
 0xd09   :  { %v2654_v46 = vsel %vm811_vm8, %v2651_v19, %v2653_v8  ;;  %v2652_v34 = vsel %vm811_vm8, %v2649_v61, %v2651_v19  ;;  %3473 = vpow2.f32 %v2836_v43 }
 0xd0a   :  { %2659 = vrot.lane.b32.xlu0 %v2654_v46, %s3497_s27  ;;  %2657 = vrot.lane.b32.xlu1 %v2652_v34, %s3497_s27  ;;  %3475 = vpow2.f32 %v2837_v20 }
 0xd0b   :  { %3477 = vpow2.f32 %v2838_v18 }
 0xd0c   :  { %3479 = vpow2.f32 %v2839_v48 }
 0xd0e   :  { %2661 = vrot.lane.b32.xlu1 %v2653_v8, %s3497_s27 }
 0xd13   :  { %v3474_v21 = vpop.eup %3473 }
 0xd14   :  { %v3476_v60 = vpop.eup %3475  ;;  %v2500_v27 = vadd.f32 1.0, %v3474_v21 }
 0xd15   :  { %v3478_v15 = vpop.eup %3477  ;;  %v2501_v32 = vadd.f32 1.0, %v3476_v60 }
 0xd16   :  { %3481 = vrcp.f32 %v2500_v27  ;;  %v2502_v4 = vadd.f32 1.0, %v3478_v15  ;;  %v3480_v45 = vpop.eup %3479 }
 0xd17   :  { %3483 = vrcp.f32 %v2501_v32  ;;  %v2503_v44 = vadd.f32 1.0, %v3480_v45 }
 0xd18   :  { %3485 = vrcp.f32 %v2502_v4 }
 0xd19   :  { %3487 = vrcp.f32 %v2503_v44 }
 0xd20   :  { %v3482_v42 = vpop.eup %3481 }
 0xd21   :  { %v3484_v52 = vpop.eup %3483 }
 0xd22   :  { %v3486_v51 = vpop.eup %3485 }
 0xd23   :  { %v3488_v56 = vpop.eup %3487 }
 0xd78   :  { %v2656_v50 = vpop.permute.xlu0 %2655 }
 0xd79   :  { %v2667_v31 = vmul.f32 %v3482_v42, %v2656_v50 }
 0xd7b   :  { %2675 = vrot.lane.b32.xlu0 %v2667_v31, %s3496_s26 }
 0xd7c   :  { %v2658_v37 = vpop.permute.xlu1 %2657  ;;  %v2660_v53 = vpop.permute.xlu0 %2659 }
 0xd7d   :  { %v2668_v36 = vmul.f32 %v3484_v52, %v2658_v37  ;;  %v2669_v54 = vmul.f32 %v3486_v51, %v2660_v53 }
 0xd7f   :  { %2677 = vrot.lane.b32.xlu1 %v2668_v36, %s3496_s26  ;;  %2679 = vrot.lane.b32.xlu0 %v2669_v54, %s3496_s26 }
 0xd80   :  { %v2662_v11 = vpop.permute.xlu1 %2661 }
 0xd81   :  { %v2670_v40 = vmul.f32 %v3488_v56, %v2662_v11 }
 0xd83   :  { %2681 = vrot.lane.b32.xlu1 %v2670_v40, %s3496_s26 }
 0xded   :  { %v2676_v3 = vpop.permute.xlu0 %2675 }
 0xdee   :  { %v2687_v41 = vadd.f32 %v4318_v7, %v2676_v3 }
 0xdf0   :  { %2695 = vrot.lane.b32.xlu0 %v2687_v41, %s3498_s3 }
 0xdf1   :  { %v2678_v62 = vpop.permute.xlu1 %2677  ;;  %v2680_v39 = vpop.permute.xlu0 %2679 }
 0xdf2   :  { %v2688_v63 = vadd.f32 %v4316_v49, %v2678_v62  ;;  %v2689_v6 = vadd.f32 %v4326_v26, %v2680_v39 }
 0xdf4   :  { %2697 = vrot.lane.b32.xlu1 %v2688_v63, %s3498_s3  ;;  %2699 = vrot.lane.b32.xlu0 %v2689_v6, %s3498_s3 }
 0xdf5   :  { %v2682_v35 = vpop.permute.xlu1 %2681 }
 0xdf6   :  { %v2690_v10 = vadd.f32 %v4322_v23, %v2682_v35 }
 0xdf8   :  { %2701 = vrot.lane.b32.xlu1 %v2690_v10, %s3498_s3 }
 0xe62   :  { %v2696_v16 = vpop.permute.xlu0 %2695 }
 0xe63   :  { %2707 = vst.msk [vmem:[%s4380_s7] sm:$0xff] %vm283_vm7, %v2696_v16 }
 0xe66   :  { %v2698_v57 = vpop.permute.xlu1 %2697  ;;  %v2700_v7 = vpop.permute.xlu0 %2699 }
 0xe67   :  { %2708 = vst.msk [vmem:[%s4380_s7 + $0x8] sm:$0xff] %vm283_vm7, %v2698_v57  ;;  %2709 = vst.msk [vmem:[%s4380_s7 + $0x10] sm:$0xff] %vm283_vm7, %v2700_v7 }
 0xe6a   :  { %v2702_v49 = vpop.permute.xlu1 %2701 }
 0xe6b   :  { %2711 = vst.msk [vmem:[%s4380_s7 + $0x18] sm:$0x3f] %vm2710_vm9, %v2702_v49 }

</bundles_post_ra>
